<compile_context>
chip_gen: v5e
topology: v5e:2x2
jax: 0.10.0
libtpu: 0.0.40
codegen_flags: <defaults>
</compile_context>

<pallas_src>
import jax
import jax.numpy as jnp
from jax import lax
from jax.experimental import pallas as pl
from jax.experimental.pallas import tpu as pltpu

BN_EPS = 1e-5
BLOCK_IN = (64, 128, 256)
BLOCK_OUT = (128, 256, 728)
STEM1_OUT = 32
STEM2_OUT = 64
_NEG = -1e30  # stands in for -inf in the max-pool stencil (f32 activations)


# ---------------------------------------------------------------------------
# In-kernel helpers (pure functions on jnp values)
# ---------------------------------------------------------------------------
def _prev(x, axis, fill=0.0):
    """out[k] = x[k-1] along `axis`, `fill` at k == 0 (unit-stride slice + concat)."""
    pad_shape = list(x.shape)
    pad_shape[axis] = 1
    pad = jnp.full(pad_shape, fill, x.dtype)
    body = lax.slice_in_dim(x, 0, x.shape[axis] - 1, axis=axis)
    return jnp.concatenate([pad, body], axis=axis)


def _next(x, axis, fill=0.0):
    """out[k] = x[k+1] along `axis`, `fill` at k == last."""
    pad_shape = list(x.shape)
    pad_shape[axis] = 1
    pad = jnp.full(pad_shape, fill, x.dtype)
    body = lax.slice_in_dim(x, 1, x.shape[axis], axis=axis)
    return jnp.concatenate([body, pad], axis=axis)


def _depthwise_phases(xe, xo, k):
    """Depthwise 3x3 / stride 1 / pad 1 in W-phase-separated form.

    xe[b,h,j,c] = x[b,h,2j,c], xo[b,h,j,c] = x[b,h,2j+1,c]; k: (3, 3, C).
    Returns (d_even_cols, d_odd_cols), both (B, H, W/2, C), all math f32.
    The per-dy row images are combined with two H-shifted adds (no padded 9-tap copies).
    """
    xo_prev = _prev(xo, axis=2)   # x[.., 2j-1]
    xe_next = _next(xe, axis=2)   # x[.., 2j+2]

    def combine(sL, sC, sR):
        a = sL * k[0, 0] + sC * k[0, 1] + sR * k[0, 2]   # weight row ky=0 (dy=-1)
        b = sL * k[1, 0] + sC * k[1, 1] + sR * k[1, 2]   # ky=1 (dy=0)
        c = sL * k[2, 0] + sC * k[2, 1] + sR * k[2, 2]   # ky=2 (dy=+1)
        return b + _prev(a, axis=1) + _next(c, axis=1)

    d_even = combine(xo_prev, xe, xo)   # cols 2j   : taps 2j-1, 2j, 2j+1
    d_odd = combine(xe, xo, xe_next)    # cols 2j+1 : taps 2j, 2j+1, 2j+2
    return d_even, d_odd


def _pointwise(x, w, b):
    """1x1 conv + folded BN shift.  MXU operands in w.dtype (bf16), f32 accumulation."""
    B, H, W, Ci = x.shape
    y = jnp.dot(x.reshape(B * H * W, Ci).astype(w.dtype), w,
                preferred_element_type=jnp.float32) + b
    return y.reshape(B, H, W, w.shape[-1])


# ---------------------------------------------------------------------------
# Kernels
# ---------------------------------------------------------------------------
def _stem_kernel(t1_ref, w1_ref, b1_ref, w2_ref, b2_ref, out_ref):
    """Stem for one image: conv3x3(s2,p1)+BN -> conv3x3(s1,p1)+BN.

    t1_ref already holds the 9 stride-2 taps (wrapper-built, 9*Cin lane channels), so conv1 is a
    single K=9*Cin matmul.  conv2 builds its 9 stride-1 taps by lane-concatenating shifted views
    and also runs as a single K=9*C1 matmul (MXU-friendly K instead of 9 thin matmuls).
    """
    f32 = jnp.float32
    nb, H, W, K1 = t1_ref.shape
    C1 = w1_ref.shape[-1]
    C2 = w2_ref.shape[-1]

    taps1 = t1_ref[...]
    y1 = jnp.dot(taps1.reshape(nb * H * W, K1).astype(w1_ref.dtype), w1_ref[...],
                 preferred_element_type=f32) + b1_ref[...]
    y1 = y1.reshape(nb, H, W, C1)

    # 9 taps of y1 concatenated on the channel (lane) axis, ordered (ky, kx, cin).
    wcat = jnp.concatenate([_prev(y1, 2), y1, _next(y1, 2)], axis=-1)          # kx = 0, 1, 2
    tcat = jnp.concatenate([_prev(wcat, 1), wcat, _next(wcat, 1)], axis=-1)    # ky = 0, 1, 2
    y2 = jnp.dot(tcat.reshape(nb * H * W, 9 * C1).astype(w2_ref.dtype), w2_ref[...],
                 preferred_element_type=f32) + b2_ref[...]
    out_ref[...] = y2.reshape(nb, H, W, C2).astype(out_ref.dtype)


def _entry_block_kernel(xe_ref, xo_ref, dw1_ref, pw1_ref, b1_ref,
                        dw2_ref, pw2_ref, b2_ref, ws_ref, bs_ref, out_ref):
    """Fused EntryBlock: 2 separable convs + BN (+ReLU) + stride-2 maxpool + shortcut + add.

    Runs on W-phase-separated activations (xe = even cols, xo = odd cols) so every stride-2
    result (pool, shortcut) is computed only at the kept positions and written with one
    lane-dense store.  No VMEM scratch, no strided loads.
    """
    f32 = jnp.float32
    xe = xe_ref[...].astype(f32)
    xo = xo_ref[...].astype(f32)
    nb, H, Wh, Cin = xe.shape
    Ho = H // 2
    Cout = pw1_ref.shape[-1]

    # SeparableConv 3x3 -> BN -> ReLU
    de, do = _depthwise_phases(xe, xo, dw1_ref[...])
    te = jnp.maximum(_pointwise(de, pw1_ref[...], b1_ref[...]), 0.0)
    to = jnp.maximum(_pointwise(do, pw1_ref[...], b1_ref[...]), 0.0)

    # SeparableConv 3x3 -> BN
    d2e, d2o = _depthwise_phases(te, to, dw2_ref[...])
    ue = _pointwise(d2e, pw2_ref[...], b2_ref[...])
    uo = _pointwise(d2o, pw2_ref[...], b2_ref[...])

    # MaxPool 3x3 / stride 2 / pad 1, evaluated only at kept (even, even) positions:
    #   cm[h, j]    = max(u[h, 2j-1], u[h, 2j], u[h, 2j+1])
    #   pooled[i,j] = max(cm[2i-1, j], cm[2i, j], cm[2i+1, j])
    cm = jnp.maximum(jnp.maximum(ue, uo), _prev(uo, axis=2, fill=_NEG))
    cm = cm.reshape(nb, Ho, 2, Wh, Cout)
    g0 = cm[:, :, 0]
    g1 = cm[:, :, 1]
    pooled = jnp.maximum(jnp.maximum(g0, g1), _prev(g1, axis=1, fill=_NEG))

    # Shortcut: 1x1 conv / stride 2 (+ folded BN, bias) on x[2i, 2j] = even rows of xe.
    xs = xe.reshape(nb, Ho, 2, Wh, Cin)[:, :, 0]
    sc = _pointwise(xs, ws_ref[...], bs_ref[...])

    out_ref[...] = (pooled + sc).astype(out_ref.dtype)


# ---------------------------------------------------------------------------
# pallas_call wrappers
# ---------------------------------------------------------------------------
def _stem_conv1_taps(x_nhwc):
    """Wrapper-side im2col for the stride-2 stem conv: 9 taps on the channel axis (ky, kx, cin)."""
    N, H0, W0, Cin = x_nhwc.shape
    assert H0 % 2 == 0 and W0 % 2 == 0, "even spatial sizes only"
    xp = jnp.pad(x_nhwc, ((0, 0), (1, 1), (1, 1), (0, 0)))
    taps = [xp[:, ky:ky + H0:2, kx:kx + W0:2, :] for ky in range(3) for kx in range(3)]
    return jnp.concatenate(taps, axis=-1)


def _stem_pallas(taps1, prep):
    N, H1, W1, K1 = taps1.shape
    C1 = prep['w1'].shape[-1]
    K2, C2 = prep['w2'].shape
    act = prep['act_dtype']
    return pl.pallas_call(
        _stem_kernel,
        out_shape=jax.ShapeDtypeStruct((N, H1, W1, C2), act),
        grid=(N,),
        in_specs=[
            pl.BlockSpec((1, H1, W1, K1), lambda n: (n, 0, 0, 0)),
            pl.BlockSpec((K1, C1), lambda n: (0, 0)),
            pl.BlockSpec((1, C1), lambda n: (0, 0)),
            pl.BlockSpec((K2, C2), lambda n: (0, 0)),
            pl.BlockSpec((1, C2), lambda n: (0, 0)),
        ],
        out_specs=pl.BlockSpec((1, H1, W1, C2), lambda n: (n, 0, 0, 0)),
        compiler_params=pltpu.CompilerParams(dimension_semantics=("parallel",)),
    )(taps1, prep['w1'], prep['b1'], prep['w2'], prep['b2'])


def _entry_block_pallas(ye, yo, p, act_dtype):
    N, H, Wh, Cin = ye.shape
    assert H % 2 == 0
    Cout = p['pw1'].shape[-1]
    Ho = H // 2
    # Deep blocks have tiny H*W: fold the batch into one grid step so the pointwise / shortcut
    # matmuls see M = nb*H*W (review: tiny-M MXU fill).
    nb = N if (H * 2 * Wh) < 256 else 1
    assert N % nb == 0
    return pl.pallas_call(
        _entry_block_kernel,
        out_shape=jax.ShapeDtypeStruct((N, Ho, Wh, Cout), act_dtype),
        grid=(N // nb,),
        in_specs=[
            pl.BlockSpec((nb, H, Wh, Cin), lambda n: (n, 0, 0, 0)),
            pl.BlockSpec((nb, H, Wh, Cin), lambda n: (n, 0, 0, 0)),
            pl.BlockSpec((3, 3, Cin), lambda n: (0, 0, 0)),
            pl.BlockSpec((Cin, Cout), lambda n: (0, 0)),
            pl.BlockSpec((1, Cout), lambda n: (0, 0)),
            pl.BlockSpec((3, 3, Cout), lambda n: (0, 0, 0)),
            pl.BlockSpec((Cout, Cout), lambda n: (0, 0)),
            pl.BlockSpec((1, Cout), lambda n: (0, 0)),
            pl.BlockSpec((Cin, Cout), lambda n: (0, 0)),
            pl.BlockSpec((1, Cout), lambda n: (0, 0)),
        ],
        out_specs=pl.BlockSpec((nb, Ho, Wh, Cout), lambda n: (n, 0, 0, 0)),
        compiler_params=pltpu.CompilerParams(dimension_semantics=("parallel",)),
    )(ye, yo, p['dw1'], p['pw1'], p['b1'], p['dw2'], p['pw2'], p['b2'], p['ws'], p['bs'])


def entry_flow_pallas(x_nchw, prep):
    act = prep['act_dtype']
    x = jnp.transpose(x_nchw, (0, 2, 3, 1))            # NCHW -> NHWC (channels on lanes)
    taps1 = _stem_conv1_taps(x).astype(act)            # stride-2 taps built once in the wrapper
    y = _stem_pallas(taps1, prep)
    for p in prep['blocks']:
        assert y.shape[1] % 2 == 0 and y.shape[2] % 2 == 0
        ye = y[:, :, 0::2, :]                          # W-phase split (plain XLA slices)
        yo = y[:, :, 1::2, :]
        y = _entry_block_pallas(ye, yo, p, act)
    y = y[..., :prep['out_channels']].astype(jnp.float32)   # drop the 728 -> 768 lane padding
    return jnp.transpose(y, (0, 3, 1, 2))               # back to NCHW


# ---------------------------------------------------------------------------
# Parameter construction / folding (wrapper side, constants)
# ---------------------------------------------------------------------------
def _pad_to(a, axis, size):
    if a.shape[axis] == size:
        return a
    pads = [(0, 0)] * a.ndim
    pads[axis] = (0, size - a.shape[axis])
    return jnp.pad(a, pads)


def _round_up(c, m=128):
    return c if c % m == 0 else ((c + m - 1) // m) * m


def prepare_params(raw, matmul_dtype=jnp.bfloat16, act_dtype=jnp.bfloat16):
    """Fold inference BN (and conv bias) into the conv weights, pad 728 -> 768 channels,
    reshape the dense stem weights to (9*Cin, Cout) and cast MXU operands to `matmul_dtype`."""
    f32 = jnp.float32

    def scale_shift(p):
        s = p['gamma'] / jnp.sqrt(p['var'] + BN_EPS)
        return s, p['beta'] - p['mean'] * s

    def dense(p):
        s, sh = scale_shift(p)
        w = (p['w'] * s).reshape(-1, p['w'].shape[-1]).astype(matmul_dtype)   # (9*Cin, Cout)
        return w, (sh + p['bias'] * s)[None, :].astype(f32)

    def sep(p, cin_p, cout_p):
        s, sh = scale_shift(p)
        dw = _pad_to(p['dw'], 2, cin_p).astype(f32)
        pw = _pad_to(_pad_to(p['pw'] * s, 1, cout_p), 0, cin_p).astype(matmul_dtype)
        return dw, pw, _pad_to(sh, 0, cout_p)[None, :].astype(f32)

    def short(p, cin_p, cout_p):
        s, sh = scale_shift(p)
        w = _pad_to(_pad_to(p['w'] * s, 1, cout_p), 0, cin_p).astype(matmul_dtype)
        return w, _pad_to(sh + p['bias'] * s, 0, cout_p)[None, :].astype(f32)

    w1, b1 = dense(raw['stem1'])
    w2, b2 = dense(raw['stem2'])
    blocks = []
    cin_p = raw['stem2']['w'].shape[-1]
    for blk in raw['blocks']:
        cout = blk['conv1']['pw'].shape[-1]
        cout_p = _round_up(cout)
        dw1, pw1, bb1 = sep(blk['conv1'], cin_p, cout_p)
        dw2, pw2, bb2 = sep(blk['conv2'], cout_p, cout_p)
        ws, bs = short(blk['shortcut'], cin_p, cout_p)
        blocks.append(dict(dw1=dw1, pw1=pw1, b1=bb1, dw2=dw2, pw2=pw2, b2=bb2, ws=ws, bs=bs))
        cin_p = cout_p
    return dict(w1=w1, b1=b1, w2=w2, b2=b2, blocks=blocks,
                out_channels=raw['blocks'][-1]['conv1']['pw'].shape[-1],
                act_dtype=act_dtype)


def init_raw_params(key, in_channels):
    kit = iter(jax.random.split(key, 128))

    def nrm(shape, scale):
        return scale * jax.random.normal(next(kit), shape, jnp.float32)

    def bn(c):
        return dict(gamma=1.0 + nrm((c,), 0.1), beta=nrm((c,), 0.1),
                    mean=nrm((c,), 0.1),
                    var=1.0 + 0.2 * jax.random.uniform(next(kit), (c,), jnp.float32))

    def dense_p(cin, cout):   # nn.Conv2d(3x3, bias=True) + BatchNorm2d
        return dict(w=nrm((3, 3, cin, cout), (9.0 * cin) ** -0.5),
                    bias=nrm((cout,), 0.1), **bn(cout))

    def sep_p(cin, cout):     # SeparableConv2d (depthwise 3x3 + pointwise, bias=False) + BN
        return dict(dw=nrm((3, 3, cin), 1.0 / 3.0),
                    pw=nrm((cin, cout), cin ** -0.5), **bn(cout))

    def short_p(cin, cout):   # nn.Conv2d(1x1, stride 2, bias=True) + BN
        return dict(w=nrm((cin, cout), cin ** -0.5),
                    bias=nrm((cout,), 0.1), **bn(cout))

    return dict(
        stem1=dense_p(in_channels, STEM1_OUT),
        stem2=dense_p(STEM1_OUT, STEM2_OUT),
        blocks=[dict(conv1=sep_p(cin, cout), conv2=sep_p(cout, cout),
                     shortcut=short_p(cin, cout))
                for cin, cout in zip(BLOCK_IN, BLOCK_OUT)],
    )


# ---------------------------------------------------------------------------
# Pure-JAX references
# ---------------------------------------------------------------------------
_HI = lax.Precision.HIGHEST


def entry_flow_module_ref(x_nhwc, raw):
    """Faithful f32 module semantics (Conv+bias -> BN -> (ReLU) ...), unfolded params."""
    def conv(x, w, stride, pad):
        return lax.conv_general_dilated(
            x, w, (stride, stride), ((pad, pad), (pad, pad)),
            dimension_numbers=("NHWC", "HWIO", "NHWC"), precision=_HI)

    def bn(x, p):
        return (x - p['mean']) * (p['gamma'] / jnp.sqrt(p['var'] + BN_EPS)) + p['beta']

    def conv_bn(x, p, stride, pad):
        return bn(conv(x, p['w'], stride, pad) + p['bias'], p)

    def sep_bn(x, p):
        c = x.shape[-1]
        d = lax.conv_general_dilated(
            x, p['dw'][:, :, None, :], (1, 1), ((1, 1), (1, 1)),
            dimension_numbers=("NHWC", "HWIO", "NHWC"),
            feature_group_count=c, precision=_HI)
        return bn(jnp.einsum('nhwc,cd->nhwd', d, p['pw'], precision=_HI), p)

    y = conv_bn(x_nhwc, raw['stem1'], 2, 1)
    y = conv_bn(y, raw['stem2'], 1, 1)
    for blk in raw['blocks']:
        sp = blk['shortcut']
        r = (jnp.einsum('nhwc,cd->nhwd', y[:, ::2, ::2, :], sp['w'], precision=_HI)
             + sp['bias'])
        r = (r - sp['mean']) * (sp['gamma'] / jnp.sqrt(sp['var'] + BN_EPS)) + sp['beta']
        t = jnp.maximum(sep_bn(y, blk['conv1']), 0.0)
        u = sep_bn(t, blk['conv2'])
        pooled = lax.reduce_window(u, -jnp.inf, lax.max,
                                   (1, 3, 3, 1), (1, 2, 2, 1),
                                   ((0, 0), (1, 1), (1, 1), (0, 0)))
        y = pooled + r
    return y


def entry_flow_mirror_ref(x_nhwc, prep):
    """Plain-JAX mirror of the kernel math (same folded / padded / cast parameters and the same
    dtype cast points) formulated independently with lax.conv / reduce_window."""
    f32 = jnp.float32
    act = prep['act_dtype']

    def dense(x, w_flat, b, stride):
        cin = w_flat.shape[0] // 9
        w = w_flat.reshape(3, 3, cin, w_flat.shape[-1])
        y = lax.conv_general_dilated(
            x.astype(w.dtype), w, (stride, stride), ((1, 1), (1, 1)),
            dimension_numbers=("NHWC", "HWIO", "NHWC"),
            preferred_element_type=f32, precision=_HI)
        return y + b

    def dwise(x, dw):
        c = x.shape[-1]
        return lax.conv_general_dilated(
            x, dw[:, :, None, :].astype(f32), (1, 1), ((1, 1), (1, 1)),
            dimension_numbers=("NHWC", "HWIO", "NHWC"),
            feature_group_count=c, precision=_HI)

    def pwise(x, w, b):
        return jnp.einsum('nhwc,cd->nhwd', x.astype(w.dtype), w,
                          preferred_element_type=f32, precision=_HI) + b

    y = dense(x_nhwc, prep['w1'], prep['b1'], 2)
    y = dense(y, prep['w2'], prep['b2'], 1).astype(act)
    for bp in prep['blocks']:
        xin = y.astype(f32)
        sc = pwise(xin[:, ::2, ::2, :], bp['ws'], bp['bs'])
        t = jnp.maximum(pwise(dwise(xin, bp['dw1']), bp['pw1'], bp['b1']), 0.0)
        u = pwise(dwise(t, bp['dw2']), bp['pw2'], bp['b2'])
        pooled = lax.reduce_window(u, -jnp.inf, lax.max,
                                   (1, 3, 3, 1), (1, 2, 2, 1),
                                   ((0, 0), (1, 1), (1, 1), (0, 0)))
        y = (pooled + sc).astype(act)
    return y[..., :prep['out_channels']].astype(f32)


# ---------------------------------------------------------------------------
if __name__ == "__main__":
    N, IN_C, H, W = 2, 3, 32, 32
    key = jax.random.PRNGKey(0)
    k_x, k_p = jax.random.split(key)
    x_nchw = jax.random.normal(k_x, (N, IN_C, H, W), jnp.float32)
    raw = init_raw_params(k_p, IN_C)

    # Pallas pipeline (bf16 MXU operands + bf16 inter-stage activations, f32 accumulation).
    prep = prepare_params(raw, matmul_dtype=jnp.bfloat16, act_dtype=jnp.bfloat16)
    out = jax.block_until_ready(entry_flow_pallas(x_nchw, prep))
    assert out.shape == (N, BLOCK_OUT[-1], H // 16, W // 16), out.shape

    x_nhwc = jnp.transpose(x_nchw, (0, 2, 3, 1))

    # (1) Kernel vs a plain-JAX mirror of the same folded/padded/bf16 math (validates the
    #     phase-separated depthwise / stride-2 pooling / shortcut decomposition + plumbing).
    mirror = jnp.transpose(entry_flow_mirror_ref(x_nhwc, prep), (0, 3, 1, 2))
    err1 = float(jnp.max(jnp.abs(out - mirror)))
    assert jnp.allclose(out, mirror, atol=3e-2, rtol=3e-2), err1

    # (2) The folded/padded parameterization in pure f32 reproduces the exact Conv+bias+BN
    #     module semantics (validates BN/bias folding, channel padding and NHWC plumbing).
    prep32 = prepare_params(raw, matmul_dtype=jnp.float32, act_dtype=jnp.float32)
    mirror32 = entry_flow_mirror_ref(x_nhwc, prep32)
    module = entry_flow_module_ref(x_nhwc, raw)
    err2 = float(jnp.max(jnp.abs(mirror32 - module)))
    assert jnp.allclose(mirror32, module, atol=2e-3, rtol=2e-3), err2

    print("KERNEL_OK")
</pallas_src>

<mosaic_0001>
module attributes {stable_mosaic.version = 11 : i64} {
  func.func @_stem_kernel(%arg0: i32, %arg1: memref<1x16x16x27xbf16, #tpu.memory_space<vmem>>, %arg2: memref<27x32xbf16, #tpu.memory_space<vmem>>, %arg3: memref<1x32xf32, #tpu.memory_space<vmem>>, %arg4: memref<288x64xbf16, #tpu.memory_space<vmem>>, %arg5: memref<1x64xf32, #tpu.memory_space<vmem>>, %arg6: memref<1x16x16x64xbf16, #tpu.memory_space<vmem>>) attributes {dimension_semantics = [#tpu.dimension_semantics<parallel>], iteration_bounds = array<i64: 2>, scalar_prefetch = 0 : i64, scratch_operands = 0 : i64, tpu.core_type = #tpu.core_type<tc>, window_params = [{transform_indices = @transform_0, window_bounds = array<i64: 1, 16, 16, 27>}, {pipeline_mode = #tpu.pipeline_mode<synchronous>, transform_indices = @transform_1, window_bounds = array<i64: 27, 32>}, {pipeline_mode = #tpu.pipeline_mode<synchronous>, transform_indices = @transform_2, window_bounds = array<i64: 1, 32>}, {pipeline_mode = #tpu.pipeline_mode<synchronous>, transform_indices = @transform_3, window_bounds = array<i64: 288, 64>}, {pipeline_mode = #tpu.pipeline_mode<synchronous>, transform_indices = @transform_4, window_bounds = array<i64: 1, 64>}, {transform_indices = @transform_5, window_bounds = array<i64: 1, 16, 16, 64>}]} {
    %c0 = arith.constant 0 : index
    %c0_0 = arith.constant 0 : index
    %c0_1 = arith.constant 0 : index
    %c0_2 = arith.constant 0 : index
    %0 = vector.load %arg1[%c0, %c0_0, %c0_1, %c0_2] : memref<1x16x16x27xbf16, #tpu.memory_space<vmem>>, vector<1x16x16x27xbf16>
    %1 = vector.shape_cast %0 : vector<1x16x16x27xbf16> to vector<256x27xbf16>
    %c0_3 = arith.constant 0 : index
    %c0_4 = arith.constant 0 : index
    %2 = vector.load %arg2[%c0_3, %c0_4] : memref<27x32xbf16, #tpu.memory_space<vmem>>, vector<27x32xbf16>
    %cst = arith.constant dense<0.000000e+00> : vector<256x32xf32>
    %3 = tpu.matmul %1, %2, %cst {dimension_numbers = #tpu.dot_dimension_numbers<[1], [0], [0], [1], [0, 0, 1, 1], [], []>} : vector<256x27xbf16>, vector<27x32xbf16>, vector<256x32xf32> -> vector<256x32xf32>
    %c0_5 = arith.constant 0 : index
    %c0_6 = arith.constant 0 : index
    %4 = vector.load %arg3[%c0_5, %c0_6] : memref<1x32xf32, #tpu.memory_space<vmem>>, vector<1x32xf32>
    %5 = vector.broadcast %4 : vector<1x32xf32> to vector<256x32xf32>
    %6 = arith.addf %3, %5 : vector<256x32xf32>
    %7 = vector.shape_cast %6 : vector<256x32xf32> to vector<1x16x16x32xf32>
    %cst_7 = arith.constant 0.000000e+00 : f32
    %8 = vector.broadcast %cst_7 : f32 to vector<1x16x1x32xf32>
    %9 = vector.extract_strided_slice %7 {offsets = [0, 0, 0, 0], sizes = [1, 16, 15, 32], strides = [1, 1, 1, 1]} : vector<1x16x16x32xf32> to vector<1x16x15x32xf32>
    %10 = tpu.concatenate %8, %9 in 2 : vector<1x16x1x32xf32>, vector<1x16x15x32xf32> -> vector<1x16x16x32xf32>
    %cst_8 = arith.constant 0.000000e+00 : f32
    %11 = vector.broadcast %cst_8 : f32 to vector<1x16x1x32xf32>
    %12 = vector.extract_strided_slice %7 {offsets = [0, 0, 1, 0], sizes = [1, 16, 15, 32], strides = [1, 1, 1, 1]} : vector<1x16x16x32xf32> to vector<1x16x15x32xf32>
    %13 = tpu.concatenate %12, %11 in 2 : vector<1x16x15x32xf32>, vector<1x16x1x32xf32> -> vector<1x16x16x32xf32>
    %14 = tpu.concatenate %10, %7, %13 in 3 : vector<1x16x16x32xf32>, vector<1x16x16x32xf32>, vector<1x16x16x32xf32> -> vector<1x16x16x96xf32>
    %cst_9 = arith.constant 0.000000e+00 : f32
    %15 = vector.broadcast %cst_9 : f32 to vector<1x1x16x96xf32>
    %16 = vector.extract_strided_slice %14 {offsets = [0, 0, 0, 0], sizes = [1, 15, 16, 96], strides = [1, 1, 1, 1]} : vector<1x16x16x96xf32> to vector<1x15x16x96xf32>
    %17 = tpu.concatenate %15, %16 in 1 : vector<1x1x16x96xf32>, vector<1x15x16x96xf32> -> vector<1x16x16x96xf32>
    %cst_10 = arith.constant 0.000000e+00 : f32
    %18 = vector.broadcast %cst_10 : f32 to vector<1x1x16x96xf32>
    %19 = vector.extract_strided_slice %14 {offsets = [0, 1, 0, 0], sizes = [1, 15, 16, 96], strides = [1, 1, 1, 1]} : vector<1x16x16x96xf32> to vector<1x15x16x96xf32>
    %20 = tpu.concatenate %19, %18 in 1 : vector<1x15x16x96xf32>, vector<1x1x16x96xf32> -> vector<1x16x16x96xf32>
    %21 = tpu.concatenate %17, %14, %20 in 3 : vector<1x16x16x96xf32>, vector<1x16x16x96xf32>, vector<1x16x16x96xf32> -> vector<1x16x16x288xf32>
    %22 = vector.shape_cast %21 : vector<1x16x16x288xf32> to vector<256x288xf32>
    %23 = arith.truncf %22 : vector<256x288xf32> to vector<256x288xbf16>
    %c0_11 = arith.constant 0 : index
    %c0_12 = arith.constant 0 : index
    %24 = vector.load %arg4[%c0_11, %c0_12] : memref<288x64xbf16, #tpu.memory_space<vmem>>, vector<288x64xbf16>
    %cst_13 = arith.constant dense<0.000000e+00> : vector<256x64xf32>
    %25 = tpu.matmul %23, %24, %cst_13 {dimension_numbers = #tpu.dot_dimension_numbers<[1], [0], [0], [1], [0, 0, 1, 1], [], []>} : vector<256x288xbf16>, vector<288x64xbf16>, vector<256x64xf32> -> vector<256x64xf32>
    %c0_14 = arith.constant 0 : index
    %c0_15 = arith.constant 0 : index
    %26 = vector.load %arg5[%c0_14, %c0_15] : memref<1x64xf32, #tpu.memory_space<vmem>>, vector<1x64xf32>
    %27 = vector.broadcast %26 : vector<1x64xf32> to vector<256x64xf32>
    %28 = arith.addf %25, %27 : vector<256x64xf32>
    %29 = vector.shape_cast %28 : vector<256x64xf32> to vector<1x16x16x64xf32>
    %30 = arith.truncf %29 : vector<1x16x16x64xf32> to vector<1x16x16x64xbf16>
    %c0_16 = arith.constant 0 : index
    %c0_17 = arith.constant 0 : index
    %c0_18 = arith.constant 0 : index
    %c0_19 = arith.constant 0 : index
    %31 = vector.load %arg6[%c0_16, %c0_17, %c0_18, %c0_19] : memref<1x16x16x64xbf16, #tpu.memory_space<vmem>>, vector<1x16x16x64xbf16>
    tpu.vector_store %arg6[%c0_16, %c0_17, %c0_18, %c0_19], %30 {strides = array<i32>} : memref<1x16x16x64xbf16, #tpu.memory_space<vmem>>, vector<1x16x16x64xbf16>,
    return
  }
  func.func @transform_0(%arg0: i32) -> (i32, i32, i32, i32) {
    %c0_i32 = arith.constant 0 : i32
    %c0_i32_0 = arith.constant 0 : i32
    %c0_i32_1 = arith.constant 0 : i32
    %c0_i32_2 = arith.constant 0 : i32
    return %arg0, %c0_i32, %c0_i32_0, %c0_i32_1 : i32, i32, i32, i32
  }
  func.func @transform_1(%arg0: i32) -> (i32, i32) {
    %c0_i32 = arith.constant 0 : i32
    %c0_i32_0 = arith.constant 0 : i32
    %c0_i32_1 = arith.constant 0 : i32
    return %c0_i32, %c0_i32_0 : i32, i32
  }
  func.func @transform_2(%arg0: i32) -> (i32, i32) {
    %c0_i32 = arith.constant 0 : i32
    %c0_i32_0 = arith.constant 0 : i32
    %c0_i32_1 = arith.constant 0 : i32
    return %c0_i32, %c0_i32_0 : i32, i32
  }
  func.func @transform_3(%arg0: i32) -> (i32, i32) {
    %c0_i32 = arith.constant 0 : i32
    %c0_i32_0 = arith.constant 0 : i32
    %c0_i32_1 = arith.constant 0 : i32
    return %c0_i32, %c0_i32_0 : i32, i32
  }
  func.func @transform_4(%arg0: i32) -> (i32, i32) {
    %c0_i32 = arith.constant 0 : i32
    %c0_i32_0 = arith.constant 0 : i32
    %c0_i32_1 = arith.constant 0 : i32
    return %c0_i32, %c0_i32_0 : i32, i32
  }
  func.func @transform_5(%arg0: i32) -> (i32, i32, i32, i32) {
    %c0_i32 = arith.constant 0 : i32
    %c0_i32_0 = arith.constant 0 : i32
    %c0_i32_1 = arith.constant 0 : i32
    %c0_i32_2 = arith.constant 0 : i32
    return %arg0, %c0_i32, %c0_i32_0, %c0_i32_1 : i32, i32, i32, i32
  }
}

</mosaic_0001>

<bundles_post_ra>
// kernel: tpu_custom_call.1
= control target key start
LH: loop header
LB: loop body
LE: loop exit
PB: predicated region body
PF: predicated region fallthrough
CT: control target
= control target key end

     0   :  { %10 = vsyncpa [#allocation3], 0  ;;  %s3754_s0 = inlined_call_operand.hbm [shape: bf16[2,16,16,27], index: 0, kind: input, shape index: {}]   ;;  %s3755_s1 = inlined_call_operand.vmem [shape: bf16[27,32], index: 1, kind: input, shape index: {}]   ;;  %s3756_s2 = inlined_call_operand.vmem [shape: f32[1,32], index: 2, kind: input, shape index: {}]   ;;  %s3757_s3 = inlined_call_operand.vmem [shape: bf16[288,64], index: 3, kind: input, shape index: {}]   ;;  %s3758_s4 = inlined_call_operand.vmem [shape: f32[1,64], index: 4, kind: input, shape index: {}]   ;;  %s3759_s5 = inlined_call_operand.hbm [shape: bf16[2,16,16,64], index: 5, kind: output, shape index: {}]  }
   0x1   :  { %12 = vsyncpa [#allocation3 + $0x1], 0 }
   0x2   :  { %13 = vsyncpa [#allocation4], 0 }
   0x3   :  { %15 = vsyncpa [#allocation4 + $0x1], 0  ;;  %s2700_s18 = smov 0   ;;  %s2702_s19 = smov 0  }
   0x4   :  { %s2704_s20 = smov 0   ;;  %s2706_s21 = smov 0  }
   0x5 LB: > { %s2721_s22 = sadd.s32 4294967295, %s2660_s21   ;;  %s1958_s23 = sadd.s32 4294967294, %s2660_s21   ;;  %s2660_s21 = sphi %s2706_s21, %s3771_s21   ;;  %s2656_s20 = sphi %s2704_s20, %s3770_s20   ;;  %s2652_s19 = sphi %s2702_s19, %s3769_s19   ;;  %s2648_s18 = sphi %s2700_s18, %s3768_s18  }
   0x6   : > { %s2725_s24 = sadd.s32 1, %s2660_s21   ;;  %s28_s25 = sadd.s32 1, %s2656_s20 }
   0x7   : > { %s25_s26 = ssub.s32 %s2660_s21, %s2725_s24  ;;  %p35_p0 = scmp.ne.s32.totalorder %s2656_s20, %s2652_s19 }
   0x8   : > { %p26_p1 = scmp.eq.s32.totalorder %s25_s26, 0  ;;  %p36_p2 = scmp.eq.s32.totalorder %s2660_s21, 0 }
   0x9   : > { %p41_p3 = scmp.ne.s32.totalorder %s2652_s19, %s2648_s18  ;;  %p42_p4 = scmp.eq.s32.totalorder %s2721_s22, 0 }
   0xa   : > { %s2737_s27 = scalar_select %p26_p1, %s2656_s20, %s28_s25  }
   0xb   : > { %p2739_p5 = por %p36_p2, %p35_p0  ;;  %p2743_p6 = por %p42_p4, %p41_p3 }
   0xc   : > { %p149_p7 = scmp.eq.s32.totalorder %s2721_s22, 1  ;;  %p155_p8 = scmp.eq.s32.totalorder %s1958_s23, 1 }
   0xd   : > { %p2203_p10 = scmp.lt.s32.totalorder %s2660_s21, 2  ;;  %s187_s7 = sand.u32 1, %s2656_s20  }
   0xe   : > { %p2750_p11 = por %p149_p7, %p35_p0  ;;  %p2754_p12 = por %p155_p8, %p41_p3 }
   0xf   : > { %s2153_s8 = sshll.u32 %s2660_s21, 7  ;;  %s1961_s9 = sshll.u32 %s187_s7, 7 }
  0x10   : > { %s196_s12 = scalar_lea.hbm %s3754_s0, %s2153_s8  ;;  %s191_s14 = scalar_lea.vmem [#allocation2], %s1961_s9 }
  0x11   : > { %s197_s13 = sshll.u32 %s196_s12, 4  ;;  %s199_s15 = sshll.u32 %s191_s14, 4  ;;  %s198_s13 = int_to_ptr.hbm [resolvable:$true] %s197_s13  ;;  %s200_s15 = int_to_ptr.vmem [resolvable:$true] %s199_s15 }
  0x12   : > { %p2765_p13 = pnand %p2203_p10, %p2739_p5  ;;  %p1964_p0 = scmp.ge.s32.totalorder %s2660_s21, 1 }
  0x13   : > { %p207_p1 = scmp.lt.s32.totalorder %s2660_s21, 3  ;;  %s188_s17 = scalar_lea.sflag [#allocation3], %s187_s7 }
  0x14   : > { %s2564_s23 = sshra.s32 %s198_s13, 4  ;;  %p2568_p3 = pneg %p2765_p13  ;;  %s2565_s23 = int_to_ptr.hbm [resolvable:$true] %s2564_s23 }
  0x15   : > { %s2566_s25 = scalar_lea.hbm %s2565_s23, 128  ;;  %s2571_s28 = scalar_lea.hbm %s3754_s0, 256 }
  0x16   : > { %p2567_p2 = scmp.ne.s32.totalorder %s2565_s23, %s2566_s25  ;;  %p2572_p5 = scmp.lt.s32.totalorder %s2565_s23, %s3754_s0 }
  0x17   : > { %p2573_p8 = scmp.lt.s32.totalorder %s2571_s28, %s2566_s25 }
  0x18   : > { %p2569_p4 = pnand %p2568_p3, %p2567_p2 }
  0x19   : > { %p2574_p10 = por %p2573_p8, %p2572_p5 }
  0x1a   : > { %p2570_p7 = pneg %p2569_p4 }
  0x1c   : > { %p2575_p9 = pnand %p2574_p10, %p2570_p7 }
  0x1e   : > { %2578 = shalt.err (!%p2575_p9)
}
  0x1f   : > { %s2662_s7 = smov 64   ;;  %s2663_s11 = smov 4  }
  0x20   : > { %2198 = dma.hbm_to_vmem [thread:$0]  (!%p2765_p13), %s198_s13, 2048, %s200_s15, %s188_s17, %s2662_s7, %s2662_s7, %s2663_s11  }
  0x21   : > { %p208_p2 = pnand %p1964_p0, %p207_p1 }
  0x22   : > { %s2786_s12 = sand.u32 (!%p208_p2), 1, %s2652_s19  }
  0x23   : > { %211 = sbr.rel (%p208_p2) target bundleno = 1043 (0x413), region = 40  ;;  %s1965_s14 = sshll.u32 (!%p208_p2), %s2786_s12, 7 }
  0x24   : > { %s214_s23 = scalar_lea.sflag (!%p208_p2), [#allocation3], %s2786_s12  ;;  %s2792_s25 = scalar_lea.vmem (!%p208_p2), [#allocation2], %s1965_s14 }
  0x28   : > { %2639 = dma.done.wait (%p2743_p6), %s214_s23, 2048  }
  0x29   : > { %2641 = vsyncadd (%p2743_p6), %s214_s23, 4294965248  ;;  %vm426_vm0 = vcmask 1044480   ;;  %vm427_vm1 = vcmask 1045504   ;;  %v2664_v0 = vmov 65535   ;;  %v2037_v2 = vld [vmem:[%s3755_s1 + $0x8] sm:$0xf] }
  0x2a   : > { %v428_v1 = vsel %vm426_vm0, 4294967295, %v2664_v0  ;;  %v2171_v3 = vld [vmem:[%s3755_s1 + $0x8] sm:$0x30]  ;;  %v2170_v7 = vld [vmem:[%s3755_s1] sm:$0xff]  ;;  %vm377_vm2 = vcmask 220160   ;;  %v2156_v10 = vld [vmem:[%s2792_s25 + $0x10] sm:$0xff] }
  0x2b   : > { %v429_v4 = vsel %vm427_vm1, %v428_v1, 0  ;;  %v2038_v5 = vor.u32 %v2171_v3, %v2037_v2  ;;  %v2154_v8 = vld [vmem:[%s2792_s25] sm:$0xff]  ;;  %v2155_v9 = vld [vmem:[%s2792_s25 + $0x8] sm:$0xff]  ;;  %v2157_v11 = vld [vmem:[%s2792_s25 + $0x18] sm:$0xff]  ;;  %vm651_vm3 = vcmask 1046528   ;;  %vm554_vm4 = vcmask 1040384  }
  0x2c   : > { %v2158_v12 = vld [vmem:[%s2792_s25 + $0x20] sm:$0xff]  ;;  %v2159_v13 = vld [vmem:[%s2792_s25 + $0x28] sm:$0xff]  ;;  %v2160_v14 = vld [vmem:[%s2792_s25 + $0x30] sm:$0xff]  ;;  %s2665_s9 = smov 32   ;;  %s2666_s10 = smov 64   ;;  %vm940_vm5 = vcmask 261120  }
  0x2d   : > { %v431_v6 = vand.u32 %v2038_v5, %v429_v4  ;;  %v2161_v16 = vld [vmem:[%s2792_s25 + $0x38] sm:$0xff]  ;;  %v2825_v17 = vld [vmem:[%s3756_s2] ss:$0 sm:$0xff]  ;;  %v2163_v57 = vld [vmem:[%s2792_s25 + $0x48] sm:$0xff]  ;;  %vm973_vm6 = vcmask 523264   ;;  %s2667_s7 = smov 96  }
  0x2e   : > { %v2162_v44 = vld [vmem:[%s2792_s25 + $0x40] sm:$0xff]  ;;  %vm1228_vm7 = vcmask 785408   ;;  %vm1836_vm10 = vcmask 519168   ;;  %s3379_s26 = scalar_lea.vmem [#allocation5], %s1965_s14  ;;  %s2190_s28 = sshll.u32 %s2721_s22, 7 }
  0x2f   : > { %439 = vmatpush.bf16.msra.mxu0 %v431_v6  ;;  %vm3091_vm8 = vmneg %vm1228_vm7  ;;  %s1881_s13 = scalar_lea.hbm %s3759_s5, %s2190_s28  ;;  %s1882_s15 = sshll.u32 %s3379_s26, 4  ;;  %s1883_s15 = int_to_ptr.vmem [resolvable:$true] %s1882_s15 }
  0x30   : > { %vm2129_vm9 = vmpackc.low %vm3091_vm8, %vm3091_vm8  ;;  %s1884_s16 = sshll.u32 %s1881_s13, 4  ;;  %s1870_s22 = scalar_lea.sflag [#allocation4], %s2786_s12  ;;  %s1885_s16 = int_to_ptr.hbm [resolvable:$true] %s1884_s16 }
  0x31   : > { %s2608_s17 = sshra.s32 %s1885_s16, 4  ;;  %s2614_s8 = scalar_lea.hbm %s3759_s5, 256  ;;  %s2609_s17 = int_to_ptr.hbm [resolvable:$true] %s2608_s17 }
  0x32   : > { %p2615_p0 = scmp.lt.s32.totalorder %s2609_s17, %s3759_s5 }
  0x33   : > { %440 = vmatpush.bf16.msra.mxu0 %v2170_v7 }
  0x36   : > { %2039 = vmatmul.msk.bf16.vlgmr.msra.gmra.mxu0 %vm377_vm2, %v2154_v8 }
  0x46   : > { %2040 = vmatmul.msk.bf16.gmra.mxu0 %vm377_vm2, %v2155_v9 }
  0x56   : > { %2041 = vmatmul.msk.bf16.gmra.mxu0 %vm377_vm2, %v2156_v10 }
  0x66   : > { %2042 = vmatmul.msk.bf16.gmra.mxu0 %vm377_vm2, %v2157_v11 }
  0x76   : > { %2043 = vmatmul.msk.bf16.gmra.mxu0 %vm377_vm2, %v2158_v12 }
  0x86   : > { %2044 = vmatmul.msk.bf16.gmra.mxu0 %vm377_vm2, %v2159_v13 }
  0x96   : > { %2045 = vmatmul.msk.bf16.gmra.mxu0 %vm377_vm2, %v2160_v14 }
  0xa6   : > { %2046 = vmatmul.msk.bf16.gmra.mxu0 %vm377_vm2, %v2161_v16 }
  0xb3   : > { %v442_v15 = vpop.f32.mrf.mxu0 }
  0xb4   : > { %v2829_v18 = vadd.f32 %v2825_v17, %v442_v15 }
  0xb6   : > { %v555_v21 = vrot.slane %v2829_v18, 7  ;;  %v652_v22 = vrot.slane %v2829_v18, 1  ;;  %2047 = vmatmul.msk.bf16.gmra.mxu0 %vm377_vm2, %v2162_v44 }
  0xbb   : > { %v444_v19 = vpop.f32.mrf.mxu0 }
  0xbc   : > { %v445_v20 = vadd.f32 %v2825_v17, %v444_v19 }
  0xbe   : > { %v556_v23 = vrot.slane %v445_v20, 7  ;;  %v2245_v24 = vpack.i.bf16 %v445_v20, %v2829_v18  ;;  %v653_v25 = vrot.slane %v445_v20, 1 }
  0xc0   : > { %2246 = vrot.lane.b32.xlu0 %v2245_v24, %s2665_s9  ;;  %v654_v26 = vsel %vm651_vm3, %v652_v22, %v653_v25  ;;  %v716_v27 = vsel %vm651_vm3, %v653_v25, 0.0  ;;  %v2841_v28 = vsel %vm554_vm4, %v555_v21, %v556_v23 }
  0xc1   : > { %v2255_v29 = vpack.i.bf16 %v716_v27, %v654_v26 }
  0xc3   : > { %v447_v30 = vpop.f32.mrf.mxu0  ;;  %2256 = vrot.lane.b32.xlu1 %v2255_v29, %s2666_s10 }
  0xc4   : > { %v2845_v31 = vadd.f32 %v2825_v17, %v447_v30 }
  0xc6   : > { %v558_v34 = vrot.slane %v2845_v31, 7  ;;  %v655_v35 = vrot.slane %v2845_v31, 1  ;;  %2048 = vmatmul.msk.bf16.gmra.mxu0 %vm377_vm2, %v2163_v57 }
  0xcb   : > { %v449_v32 = vpop.f32.mrf.mxu0 }
  0xcc   : > { %v450_v33 = vadd.f32 %v2825_v17, %v449_v32 }
  0xce   : > { %v559_v36 = vrot.slane %v450_v33, 7  ;;  %v656_v37 = vrot.slane %v450_v33, 1  ;;  %v2250_v38 = vpack.i.bf16 %v450_v33, %v2845_v31  ;;  %v2164_v33 = vld [vmem:[%s2792_s25 + $0x50] sm:$0xff] }
  0xd0   : > { %2251 = vrot.lane.b32.xlu0 %v2250_v38, %s2665_s9  ;;  %v657_v39 = vsel %vm651_vm3, %v655_v35, %v656_v37  ;;  %v717_v40 = vsel %vm651_vm3, %v656_v37, 0.0  ;;  %v2857_v41 = vsel %vm554_vm4, %v558_v34, %v559_v36 }
  0xd1   : > { %v2260_v42 = vpack.i.bf16 %v717_v40, %v657_v39 }
  0xd3   : > { %v452_v43 = vpop.f32.mrf.mxu0  ;;  %2261 = vrot.lane.b32.xlu1 %v2260_v42, %s2666_s10 }
  0xd4   : > { %v2863_v45 = vadd.f32 %v2825_v17, %v452_v43 }
  0xd6   : > { %v561_v47 = vrot.slane %v2863_v45, 7  ;;  %v658_v51 = vrot.slane %v2863_v45, 1  ;;  %2049 = vmatmul.msk.bf16.gmra.mxu0 %vm377_vm2, %v2164_v33 }
  0xdb   : > { %v454_v46 = vpop.f32.mrf.mxu0 }
  0xdc   : > { %v455_v48 = vadd.f32 %v2825_v17, %v454_v46 }
  0xde   : > { %v562_v49 = vrot.slane %v455_v48, 7  ;;  %v2265_v50 = vpack.i.bf16 %v455_v48, %v2863_v45  ;;  %v659_v52 = vrot.slane %v455_v48, 1 }
  0xe0   : > { %2266 = vrot.lane.b32.xlu2 %v2265_v50, %s2665_s9  ;;  %v2873_v53 = vsel %vm554_vm4, %v561_v47, %v562_v49  ;;  %v660_v55 = vsel %vm651_vm3, %v658_v51, %v659_v52  ;;  %v718_v56 = vsel %vm651_vm3, %v659_v52, 0.0  ;;  %v635_v49 = vsel %vm554_vm4, 0.0, %v555_v21 }
  0xe1   : > { %v2270_v58 = vpack.i.bf16 %v718_v56, %v660_v55  ;;  %v2165_v55 = vld [vmem:[%s2792_s25 + $0x58] sm:$0xff] }
  0xe3   : > { %v457_v54 = vpop.f32.mrf.mxu0 }
  0xe4   : > { %v2879_v59 = vadd.f32 %v2825_v17, %v457_v54 }
  0xe6   : > { %v564_v61 = vrot.slane %v2879_v59, 7  ;;  %v661_v62 = vrot.slane %v2879_v59, 1  ;;  %2050 = vmatmul.msk.bf16.gmra.mxu0 %vm377_vm2, %v2165_v55 }
  0xe8   : > { %2271 = vrot.lane.b32.xlu2 %v2270_v58, %s2666_s10 }
  0xeb   : > { %v459_v60 = vpop.f32.mrf.mxu0 }
  0xec   : > { %v460_v63 = vadd.f32 %v2825_v17, %v459_v60 }
  0xee   : > { %v565_v0 = vrot.slane %v460_v63, 7  ;;  %v662_v1 = vrot.slane %v460_v63, 1  ;;  %v2275_v2 = vpack.i.bf16 %v460_v63, %v2879_v59  ;;  %v2174_v59 = vld [vmem:[%s3757_s3 + $0x10] sm:$0xff] }
  0xf0   : > { %2276 = vrot.lane.b32.xlu0 %v2275_v2, %s2665_s9  ;;  %v663_v3 = vsel %vm651_vm3, %v661_v62, %v662_v1  ;;  %v719_v4 = vsel %vm651_vm3, %v662_v1, 0.0  ;;  %v2893_v5 = vsel %vm554_vm4, %v564_v61, %v565_v0  ;;  %v637_v2 = vsel %vm554_vm4, 0.0, %v561_v47 }
  0xf1   : > { %v2280_v6 = vpack.i.bf16 %v719_v4, %v663_v3 }
  0xf3   : > { %v462_v7 = vpop.f32.mrf.mxu0  ;;  %2281 = vrot.lane.b32.xlu1 %v2280_v6, %s2666_s10 }
  0xf4   : > { %v2897_v8 = vadd.f32 %v2825_v17, %v462_v7 }
  0xf6   : > { %v567_v12 = vrot.slane %v2897_v8, 7  ;;  %v664_v13 = vrot.slane %v2897_v8, 1 }
  0xfb   : > { %v464_v9 = vpop.f32.mrf.mxu0 }
  0xfc   : > { %v465_v10 = vadd.f32 %v2825_v17, %v464_v9 }
  0xfe   : > { %v2295_v11 = vpack.i.bf16 %v465_v10, %v2897_v8  ;;  %v568_v14 = vrot.slane %v465_v10, 7  ;;  %v665_v15 = vrot.slane %v465_v10, 1 }
 0x100   : > { %2296 = vrot.lane.b32.xlu1 %v2295_v11, %s2665_s9  ;;  %v666_v19 = vsel %vm651_vm3, %v664_v13, %v665_v15  ;;  %v720_v20 = vsel %vm651_vm3, %v665_v15, 0.0  ;;  %v2909_v22 = vsel %vm554_vm4, %v567_v12, %v568_v14 }
 0x101   : > { %v2300_v23 = vpack.i.bf16 %v720_v20, %v666_v19 }
 0x103   : > { %v467_v16 = vpop.f32.mrf.mxu0 }
 0x104   : > { %v2912_v25 = vadd.f32 %v2825_v17, %v467_v16  ;;  %v636_v16 = vsel %vm554_vm4, 0.0, %v558_v34 }
 0x106   : > { %v570_v27 = vrot.slane %v2912_v25, 7 }
 0x10b   : > { %v469_v24 = vpop.f32.mrf.mxu0 }
 0x10c   : > { %v2915_v26 = vadd.f32 %v2825_v17, %v469_v24 }
 0x10e   : > { %v571_v29 = vrot.slane %v2915_v26, 7  ;;  %v2315_v33 = vpack.i.bf16 %v2915_v26, %v2912_v25 }
 0x110   : > { %v2922_v32 = vsel %vm554_vm4, %v570_v27, %v571_v29 }
 0x113   : > { %v472_v30 = vpop.f32.mrf.mxu0 }
 0x114   : > { %v2927_v36 = vadd.f32 %v2825_v17, %v472_v30 }
 0x116   : > { %v573_v38 = vrot.slane %v2927_v36, 7 }
 0x11b   : > { %v474_v35 = vpop.f32.mrf.mxu0 }
 0x11c   : > { %v2930_v37 = vadd.f32 %v2825_v17, %v474_v35 }
 0x11e   : > { %v574_v39 = vrot.slane %v2930_v37, 7  ;;  %v671_v35 = vrot.slane %v2930_v37, 1  ;;  %v2335_v55 = vpack.i.bf16 %v2930_v37, %v2927_v36  ;;  %v638_v37 = vsel %vm554_vm4, 0.0, %v564_v61  ;;  %v2173_v61 = vld [vmem:[%s3757_s3 + $0x8] sm:$0xff] }
 0x120   : > { %v2937_v48 = vsel %vm554_vm4, %v573_v38, %v574_v39 }
 0x123   : > { %v477_v44 = vpop.f32.mrf.mxu0 }
 0x124   : > { %v2957_v60 = vadd.f32 %v2825_v17, %v477_v44 }
 0x126   : > { %v576_v0 = vrot.slane %v2957_v60, 7 }
 0x12b   : > { %v479_v21 = vpop.f32.mrf.mxu0 }
 0x132   : > { %v2247_v40 = vpop.permute.xlu0 %2246 }
 0x133   : > { %v2249_v42 = vunpack.i.h.bf16 %v2247_v40  ;;  %v2248_v43 = vunpack.i.l.bf16 %v2247_v40  ;;  %v722_v40 = vsel %vm651_vm3, %v671_v35, 0.0 }
 0x135   : > { %v2257_v46 = vpop.permute.xlu1 %2256  ;;  %v941_v52 = vsel %vm940_vm5, %v635_v49, %v2248_v43  ;;  %v942_v54 = vsel %vm940_vm5, %v2841_v28, %v2249_v42  ;;  %v2960_v28 = vadd.f32 %v2825_v17, %v479_v21  ;;  %v667_v42 = vrot.slane %v2912_v25, 1 }
 0x136   : > { %v2259_v50 = vunpack.i.h.bf16 %v2257_v46  ;;  %v2258_v51 = vunpack.i.l.bf16 %v2257_v46  ;;  %v668_v43 = vrot.slane %v2915_v26, 1  ;;  %v2179_v46 = vld [vmem:[%s3757_s3 + $0x38] sm:$0xff]  ;;  %v2178_v26 = vld [vmem:[%s3757_s3 + $0x30] sm:$0xff] }
 0x137   : > { %v577_v1 = vrot.slane %v2960_v28, 7  ;;  %1537 = vmatpush.bf16.msra.mxu1 %v2179_v46 }
 0x138   : > { %v2947_v56 = vsel %vm973_vm6, %v941_v52, %v2258_v51  ;;  %v2950_v57 = vsel %vm973_vm6, %v942_v54, %v2259_v50  ;;  %v669_v49 = vsel %vm651_vm3, %v667_v42, %v668_v43  ;;  %v721_v50 = vsel %vm651_vm3, %v668_v43, 0.0  ;;  %v2177_v54 = vld [vmem:[%s3757_s3 + $0x28] sm:$0xff]  ;;  %v2182_v43 = vld [vmem:[%s3757_s3 + $0x50] sm:$0xff] }
 0x139   : > { %v2285_v58 = vpack.i.bf16 %v2950_v57, %v2947_v56  ;;  %v2974_v45 = vsel %vm554_vm4, %v576_v0, %v577_v1  ;;  %v2320_v51 = vpack.i.bf16 %v721_v50, %v669_v49  ;;  %v2355_v52 = vpack.i.bf16 %v2960_v28, %v2957_v60  ;;  %v2175_v1 = vld [vmem:[%s3757_s3 + $0x18] sm:$0xff] }
 0x13a   : > { %v2267_v18 = vpop.permute.xlu2 %2266 }
 0x13b   : > { %2286 = vrot.lane.b32.xlu2 %v2285_v58, %s2667_s7  ;;  %v2269_v62 = vunpack.i.h.bf16 %v2267_v18  ;;  %v2268_v63 = vunpack.i.l.bf16 %v2267_v18  ;;  %1538 = vmatpush.bf16.msra.mxu1 %v2178_v26 }
 0x13d   : > { %v945_v11 = vsel %vm940_vm5, %v637_v2, %v2268_v63  ;;  %v946_v13 = vsel %vm940_vm5, %v2873_v53, %v2269_v62  ;;  %v2176_v62 = vld [vmem:[%s3757_s3 + $0x20] sm:$0xff] }
 0x13f   : > { %1539 = vmatpush.bf16.msra.mxu1 %v2177_v54  ;;  %v2189_v54 = vld [vmem:[%s3757_s3 + $0x88] sm:$0xff] }
 0x140   : > { %1721 = vmatpush.bf16.msra.mxu3 %v2189_v54 }
 0x142   : > { %v2272_v3 = vpop.permute.xlu2 %2271  ;;  %v2252_v4 = vpop.permute.xlu0 %2251 }
 0x143   : > { %v2274_v6 = vunpack.i.h.bf16 %v2272_v3  ;;  %v2273_v7 = vunpack.i.l.bf16 %v2272_v3  ;;  %v2254_v9 = vunpack.i.h.bf16 %v2252_v4  ;;  %v2253_v10 = vunpack.i.l.bf16 %v2252_v4  ;;  %2301 = vrot.lane.b32.xlu2 %v2300_v23, %s2666_s10  ;;  %v2166_v23 = vld [vmem:[%s2792_s25 + $0x60] sm:$0xff]  ;;  %1540 = vmatpush.bf16.msra.mxu1 %v2176_v62 }
 0x144   : > { %2051 = vmatmul.msk.bf16.gmra.mxu0 %vm377_vm2, %v2166_v23 }
 0x145   : > { %v2262_v47 = vpop.permute.xlu1 %2261  ;;  %v2977_v14 = vsel %vm973_vm6, %v945_v11, %v2273_v7  ;;  %v2980_v15 = vsel %vm973_vm6, %v946_v13, %v2274_v6  ;;  %v944_v24 = vsel %vm940_vm5, %v2857_v41, %v2254_v9  ;;  %v943_v29 = vsel %vm940_vm5, %v636_v16, %v2253_v10 }
 0x146   : > { %v2264_v19 = vunpack.i.h.bf16 %v2262_v47  ;;  %v2263_v20 = vunpack.i.l.bf16 %v2262_v47  ;;  %v2310_v53 = vpack.i.bf16 %v2980_v15, %v2977_v14  ;;  %v670_v41 = vrot.slane %v2927_v36, 1  ;;  %v2172_v47 = vld [vmem:[%s3757_s3] sm:$0xff] }
 0x147   : > { %1541 = vmatpush.bf16.msra.mxu1 %v2175_v1  ;;  %v673_v11 = vrot.slane %v2957_v60, 1  ;;  %v674_v13 = vrot.slane %v2960_v28, 1  ;;  %v639_v1 = vsel %vm554_vm4, 0.0, %v567_v12 }
 0x148   : > { %2311 = vrot.lane.b32.xlu1 %v2310_v53, %s2666_s10  ;;  %v2993_v30 = vsel %vm973_vm6, %v943_v29, %v2263_v20  ;;  %v2996_v31 = vsel %vm973_vm6, %v944_v24, %v2264_v19  ;;  %v672_v39 = vsel %vm651_vm3, %v670_v41, %v671_v35  ;;  %v2187_v29 = vld [vmem:[%s3757_s3 + $0x78] sm:$0xff]  ;;  %v2184_v41 = vld [vmem:[%s3757_s3 + $0x60] sm:$0xff] }
 0x149   : > { %v2290_v34 = vpack.i.bf16 %v2996_v31, %v2993_v30  ;;  %v2340_v44 = vpack.i.bf16 %v722_v40, %v672_v39  ;;  %v675_v16 = vsel %vm651_vm3, %v673_v11, %v674_v13  ;;  %v723_v19 = vsel %vm651_vm3, %v674_v13, 0.0  ;;  %1626 = vmatpush.bf16.msra.mxu2 %v2187_v29  ;;  %v2183_v35 = vld [vmem:[%s3757_s3 + $0x58] sm:$0xff]  ;;  %v2167_v39 = vld [vmem:[%s2792_s25 + $0x68] sm:$0xff] }
 0x14b   : > { %2291 = vrot.lane.b32.xlu0 %v2290_v34, %s2666_s10  ;;  %2316 = vrot.lane.b32.xlu2 %v2315_v33, %s2665_s9  ;;  %v2185_v33 = vld [vmem:[%s3757_s3 + $0x68] sm:$0xff] }
 0x14c   : > { %1542 = vmatpush.bf16.msra.mxu1 %v2174_v59 }
 0x150   : > { %2326 = vrot.lane.b32.xlu1 %v2310_v53, %s2667_s7  ;;  %1543 = vmatpush.bf16.msra.mxu1 %v2173_v61  ;;  %v2360_v53 = vpack.i.bf16 %v723_v19, %v675_v16 }
 0x153   : > { %2306 = vrot.lane.b32.xlu0 %v2290_v34, %s2667_s7  ;;  %v2186_v34 = vld [vmem:[%s3757_s3 + $0x70] sm:$0xff] }
 0x154   : > { %1544 = vmatpush.bf16.msra.mxu1 %v2172_v47  ;;  %1627 = vmatpush.bf16.msra.mxu2 %v2186_v34 }
 0x155   : > { %2052 = vmatmul.msk.bf16.gmra.mxu0 %vm377_vm2, %v2167_v39 }
 0x158   : > { %2341 = vrot.lane.b32.xlu1 %v2340_v44, %s2666_s10  ;;  %1628 = vmatpush.bf16.msra.mxu2 %v2185_v33 }
 0x15b   : > { %2321 = vrot.lane.b32.xlu0 %v2320_v51, %s2666_s10 }
 0x15c   : > { %1629 = vmatpush.bf16.msra.mxu2 %v2184_v41  ;;  %v2168_v41 = vld [vmem:[%s2792_s25 + $0x70] sm:$0xff] }
 0x160   : > { %2356 = vrot.lane.b32.xlu1 %v2355_v52, %s2665_s9  ;;  %1630 = vmatpush.bf16.msra.mxu2 %v2183_v35 }
 0x162   : > { %v2277_v58 = vpop.permute.xlu0 %2276 }
 0x163   : > { %v2279_v18 = vunpack.i.h.bf16 %v2277_v58  ;;  %v2278_v21 = vunpack.i.l.bf16 %v2277_v58  ;;  %2336 = vrot.lane.b32.xlu0 %v2335_v55, %s2665_s9  ;;  %v2181_v55 = vld [vmem:[%s3757_s3 + $0x48] sm:$0xff] }
 0x164   : > { %1631 = vmatpush.bf16.msra.mxu2 %v2182_v43 }
 0x165   : > { %v2282_v63 = vpop.permute.xlu1 %2281  ;;  %v948_v4 = vsel %vm940_vm5, %v2893_v5, %v2279_v18  ;;  %v947_v6 = vsel %vm940_vm5, %v638_v37, %v2278_v21  ;;  %v482_v5 = vpop.f32.mrf.mxu0  ;;  %2053 = vmatmul.msk.bf16.gmra.mxu0 %vm377_vm2, %v2168_v41 }
 0x166   : > { %v2284_v2 = vunpack.i.h.bf16 %v2282_v63  ;;  %v2283_v3 = vunpack.i.l.bf16 %v2282_v63  ;;  %v3068_v23 = vadd.f32 %v2825_v17, %v482_v5  ;;  %v2188_v63 = vld [vmem:[%s3757_s3 + $0x80] sm:$0xff] }
 0x167   : > { %1722 = vmatpush.bf16.msra.mxu3 %v2188_v63 }
 0x168   : > { %v3045_v7 = vsel %vm973_vm6, %v947_v6, %v2283_v3  ;;  %v3048_v9 = vsel %vm973_vm6, %v948_v4, %v2284_v2  ;;  %v579_v50 = vrot.slane %v3068_v23, 7  ;;  %1632 = vmatpush.bf16.msra.mxu2 %v2181_v55  ;;  %v2180_v4 = vld [vmem:[%s3757_s3 + $0x40] sm:$0xff]  ;;  %v676_v47 = vrot.slane %v3068_v23, 1 }
 0x169   : > { %v2330_v10 = vpack.i.bf16 %v3048_v9, %v3045_v7 }
 0x16b   : > { %2331 = vrot.lane.b32.xlu2 %v2330_v10, %s2666_s10 }
 0x16c   : > { %1633 = vmatpush.bf16.msra.mxu2 %v2180_v4 }
 0x16d   : > { %v484_v20 = vpop.f32.mrf.mxu0 }
 0x16e   : > { %v485_v28 = vadd.f32 %v2825_v17, %v484_v20 }
 0x170   : > { %v2375_v24 = vpack.i.bf16 %v485_v28, %v3068_v23  ;;  %v580_v51 = vrot.slane %v485_v28, 7  ;;  %v677_v16 = vrot.slane %v485_v28, 1 }
 0x172   : > { %v2297_v26 = vpop.permute.xlu1 %2296  ;;  %v3118_v21 = vsel %vm554_vm4, %v579_v50, %v580_v51  ;;  %v678_v20 = vsel %vm651_vm3, %v676_v47, %v677_v16 }
 0x173   : > { %2346 = vrot.lane.b32.xlu2 %v2330_v10, %s2667_s7  ;;  %v2299_v58 = vunpack.i.h.bf16 %v2297_v26  ;;  %v2298_v18 = vunpack.i.l.bf16 %v2297_v26 }
 0x175   : > { %v487_v42 = vpop.f32.mrf.mxu0  ;;  %v950_v6 = vsel %vm940_vm5, %v2909_v22, %v2299_v58  ;;  %v949_v10 = vsel %vm940_vm5, %v639_v1, %v2298_v18 }
 0x176   : > { %v3142_v61 = vadd.f32 %v2825_v17, %v487_v42 }
 0x178   : > { %v582_v11 = vrot.slane %v3142_v61, 7 }
 0x17b   : > { %2361 = vrot.lane.b32.xlu2 %v2360_v53, %s2666_s10  ;;  %v724_v53 = vsel %vm651_vm3, %v677_v16, 0.0 }
 0x17d   : > { %v489_v3 = vpop.f32.mrf.mxu0 }
 0x17e   : > { %v3145_v22 = vadd.f32 %v2825_v17, %v489_v3  ;;  %v2169_v3 = vld [vmem:[%s2792_s25 + $0x78] sm:$0xff]  ;;  %s2610_s25 = scalar_lea.hbm %s2609_s17, 128 }
 0x17f   : > { %2054 = vmatmul.msk.bf16.gmra.mxu0 %vm377_vm2, %v2169_v3  ;;  %p2611_p6 = scmp.ne.s32.totalorder %s2609_s17, %s2610_s25  ;;  %p2616_p1 = scmp.lt.s32.totalorder %s2614_s8, %s2610_s25 }
 0x180   : > { %v583_v13 = vrot.slane %v3145_v22, 7  ;;  %v2395_v33 = vpack.i.bf16 %v3145_v22, %v3142_v61 }
 0x181   : > { %p2612_p9 = pnand %p2611_p6, %p2750_p11  ;;  %p2617_p3 = por %p2616_p1, %p2615_p0 }
 0x182   : > { %v3154_v19 = vsel %vm554_vm4, %v582_v11, %v583_v13 }
 0x183   : > { %2376 = vrot.lane.b32.xlu2 %v2375_v24, %s2665_s9  ;;  %v2380_v24 = vpack.i.bf16 %v724_v53, %v678_v20  ;;  %p2613_p13 = pneg %p2612_p9 }
 0x185   : > { %v492_v5 = vpop.f32.mrf.mxu0  ;;  %p2618_p4 = pnand %p2617_p3, %p2613_p13 }
 0x186   : > { %v3160_v34 = vadd.f32 %v2825_v17, %v492_v5 }
 0x188   : > { %v585_v35 = vrot.slane %v3160_v34, 7 }
 0x18d   : > { %v494_v29 = vpop.f32.mrf.mxu0 }
 0x18e   : > { %v3163_v28 = vadd.f32 %v2825_v17, %v494_v29 }
 0x190   : > { %v586_v39 = vrot.slane %v3163_v28, 7 }
 0x192   : > { %v3175_v43 = vsel %vm554_vm4, %v585_v35, %v586_v39 }
 0x195   : > { %v3098_v44 = vpop.permute.xlu2 %2286  ;;  %v497_v42 = vpop.f32.mrf.mxu0 }
 0x196   : > { %v2289_v46 = vunpack.i.h.bf16 %v3098_v44  ;;  %v2288_v49 = vunpack.i.l.bf16 %v3098_v44 }
 0x198   : > { %v2130_v52 = vpack.c.bf16 %v2289_v46, %v2288_v49 }
 0x19a   : > { %2131 = vmatmul.msk.bf16.vlgmr.msra.gmra.mxu1 %vm2129_vm9, %v2130_v52 }
 0x19d   : > { %v2302_v62 = vpop.permute.xlu2 %2301  ;;  %v499_v1 = vpop.f32.mrf.mxu0 }
 0x19e   : > { %v2304_v37 = vunpack.i.h.bf16 %v2302_v62  ;;  %v2303_v2 = vunpack.i.l.bf16 %v2302_v62  ;;  %v3191_v44 = vadd.f32 %v2825_v17, %v499_v1 }
 0x1a0   : > { %v3133_v59 = vsel %vm973_vm6, %v949_v10, %v2303_v2  ;;  %v3136_v8 = vsel %vm973_vm6, %v950_v6, %v2304_v37  ;;  %v3188_v10 = vadd.f32 %v2825_v17, %v497_v42  ;;  %v589_v5 = vrot.slane %v3191_v44, 7 }
 0x1a1   : > { %v2350_v12 = vpack.i.bf16 %v3136_v8, %v3133_v59 }
 0x1a3   : > { %2351 = vrot.lane.b32.xlu0 %v2350_v12, %s2666_s10 }
 0x1a5   : > { %v2317_v51 = vpop.permute.xlu2 %2316 }
 0x1a6   : > { %v2319_v16 = vunpack.i.h.bf16 %v2317_v51  ;;  %v2318_v20 = vunpack.i.l.bf16 %v2317_v51 }
 0x1ab   : > { %2366 = vrot.lane.b32.xlu0 %v2350_v12, %s2667_s7  ;;  %v588_v12 = vrot.slane %v3188_v10, 7 }
 0x1b3   : > { %2381 = vrot.lane.b32.xlu0 %v2380_v24, %s2666_s10 }
 0x1ba   : > { %v2312_v40 = vpop.permute.xlu1 %2311 }
 0x1bb   : > { %2396 = vrot.lane.b32.xlu0 %v2395_v33, %s2665_s9  ;;  %v2314_v53 = vunpack.i.h.bf16 %v2312_v40  ;;  %v2313_v24 = vunpack.i.l.bf16 %v2312_v40  ;;  %v952_v40 = vsel %vm940_vm5, %v2922_v32, %v2319_v16 }
 0x1bd   : > { %v2292_v26 = vpop.permute.xlu0 %2291 }
 0x1be   : > { %v2294_v52 = vunpack.i.h.bf16 %v2292_v26  ;;  %v2293_v54 = vunpack.i.l.bf16 %v2292_v26 }
 0x1c0   : > { %v1295_v55 = vpack.c.bf16 %v2294_v52, %v2293_v54  ;;  %v1261_v58 = vsel %vm973_vm6, %v2288_v49, %v2293_v54  ;;  %v1262_v18 = vsel %vm973_vm6, %v2289_v46, %v2294_v52  ;;  %v1298_v52 = vpack.c.bf16 %v2314_v53, %v2313_v24 }
 0x1c1   : > { %v1294_v62 = vpack.c.bf16 %v1262_v18, %v1261_v58 }
 0x1c2   : > { %v3181_v63 = vpop.permute.xlu1 %2326  ;;  %2132 = vmatmul.msk.bf16.vlgmr.msra.gmra.mxu3 %vm940_vm5, %v1295_v55 }
 0x1c3   : > { %1634 = vmatmul.bf16.vlgmr.msra.gmra.mxu2 %v1294_v62  ;;  %v2328_v55 = vunpack.i.l.bf16 %v3181_v63 }
 0x1c5   : > { %v2307_v37 = vpop.permute.xlu0 %2306  ;;  %v3184_v2 = vpop.permute.xlu2 %2331 }
 0x1c6   : > { %v2309_v4 = vunpack.i.h.bf16 %v2307_v37  ;;  %v2308_v6 = vunpack.i.l.bf16 %v2307_v37  ;;  %v641_v37 = vsel %vm554_vm4, 0.0, %v573_v38 }
 0x1c8   : > { %v1231_v46 = vsel %vm1228_vm7, %v2947_v56, %v2308_v6  ;;  %v1232_v49 = vsel %vm1228_vm7, %v2950_v57, %v2309_v4  ;;  %v3203_v56 = vsel %vm554_vm4, %v588_v12, %v589_v5  ;;  %v640_v57 = vsel %vm554_vm4, 0.0, %v570_v27 }
 0x1c9   : > { %v1296_v13 = vpack.c.bf16 %v1232_v49, %v1231_v46  ;;  %v1263_v42 = vsel %vm973_vm6, %v2308_v6, %v2313_v24  ;;  %v1264_v51 = vsel %vm973_vm6, %v2309_v4, %v2314_v53  ;;  %v951_v26 = vsel %vm940_vm5, %v640_v57, %v2318_v20 }
 0x1ca   : > { %v2342_v47 = vpop.permute.xlu1 %2341  ;;  %v2329_v27 = vunpack.i.h.bf16 %v3181_v63  ;;  %v1297_v18 = vpack.c.bf16 %v1264_v51, %v1263_v42  ;;  %v642_v63 = vsel %vm554_vm4, 0.0, %v576_v0  ;;  %v1233_v6 = vsel %vm1228_vm7, %v2993_v30, %v2328_v55 }
 0x1cb   : > { %1550 = vmatmul.bf16.gmra.mxu1 %v1296_v13  ;;  %v2344_v20 = vunpack.i.h.bf16 %v2342_v47  ;;  %v2343_v36 = vunpack.i.l.bf16 %v2342_v47  ;;  %v679_v57 = vrot.slane %v3142_v61, 1  ;;  %v2333_v42 = vunpack.i.l.bf16 %v3184_v2 }
 0x1cc   : > { %v1234_v46 = vsel %vm1228_vm7, %v2996_v31, %v2329_v27 }
 0x1cd   : > { %v2322_v29 = vpop.permute.xlu0 %2321  ;;  %v3208_v33 = vpop.permute.xlu2 %2346 }
 0x1ce   : > { %v2324_v41 = vunpack.i.h.bf16 %v2322_v29  ;;  %v2323_v39 = vunpack.i.l.bf16 %v2322_v29  ;;  %v1299_v29 = vpack.c.bf16 %v1234_v46, %v1233_v6 }
 0x1d0   : > { %v3216_v54 = vsel %vm973_vm6, %v951_v26, %v2323_v39  ;;  %v3219_v25 = vsel %vm973_vm6, %v952_v40, %v2324_v41  ;;  %v2334_v39 = vunpack.i.h.bf16 %v3184_v2  ;;  %v1265_v26 = vsel %vm973_vm6, %v2328_v55, %v2333_v42 }
 0x1d1   : > { %v2370_v58 = vpack.i.bf16 %v3219_v25, %v3216_v54  ;;  %v686_v2 = vrot.slane %v3191_v44, 1 }
 0x1d2   : > { %v2357_v62 = vpop.permute.xlu1 %2356  ;;  %2133 = vmatmul.msk.bf16.gmra.mxu3 %vm940_vm5, %v1298_v52  ;;  %v1266_v52 = vsel %vm973_vm6, %v2329_v27, %v2334_v39 }
 0x1d3   : > { %v2359_v32 = vunpack.i.h.bf16 %v2357_v62  ;;  %v2358_v1 = vunpack.i.l.bf16 %v2357_v62  ;;  %2371 = vrot.lane.b32.xlu1 %v2370_v58, %s2666_s10  ;;  %1639 = vmatmul.bf16.gmra.mxu2 %v1297_v18  ;;  %v1301_v18 = vpack.c.bf16 %v2334_v39, %v2333_v42  ;;  %v685_v62 = vrot.slane %v3188_v10, 1 }
 0x1d4   : > { %v727_v55 = vsel %vm651_vm3, %v686_v2, 0.0 }
 0x1d5   : > { %v2337_v3 = vpop.permute.xlu0 %2336  ;;  %v2362_v4 = vpop.permute.xlu2 %2361  ;;  %v956_v38 = vsel %vm940_vm5, %v2974_v45, %v2359_v32  ;;  %v955_v60 = vsel %vm940_vm5, %v642_v63, %v2358_v1  ;;  %v682_v32 = vrot.slane %v3160_v34, 1  ;;  %v683_v1 = vrot.slane %v3163_v28, 1 }
 0x1d6   : > { %v2339_v49 = vunpack.i.h.bf16 %v2337_v3  ;;  %v2338_v5 = vunpack.i.l.bf16 %v2337_v3  ;;  %v2364_v13 = vunpack.i.h.bf16 %v2362_v4  ;;  %v2363_v16 = vunpack.i.l.bf16 %v2362_v4 }
 0x1d7   : > { %v2349_v63 = vunpack.i.h.bf16 %v3208_v33  ;;  %v2348_v3 = vunpack.i.l.bf16 %v3208_v33  ;;  %v687_v27 = vsel %vm651_vm3, %v685_v62, %v686_v2  ;;  %v684_v4 = vsel %vm651_vm3, %v682_v32, %v683_v1 }
 0x1d8   : > { %v954_v0 = vsel %vm940_vm5, %v2937_v48, %v2339_v49  ;;  %v953_v53 = vsel %vm940_vm5, %v641_v37, %v2338_v5  ;;  %v3244_v30 = vsel %vm973_vm6, %v955_v60, %v2363_v16  ;;  %v3247_v31 = vsel %vm973_vm6, %v956_v38, %v2364_v13 }
 0x1d9   : > { %v2410_v24 = vpack.i.bf16 %v3247_v31, %v3244_v30  ;;  %v3252_v47 = vsel %vm973_vm6, %v953_v53, %v2343_v36  ;;  %v3255_v45 = vsel %vm973_vm6, %v954_v0, %v2344_v20  ;;  %v680_v48 = vrot.slane %v3145_v22, 1  ;;  %v502_v22 = vpop.f32.mrf.mxu0 }
 0x1da   : > { %v2390_v41 = vpack.i.bf16 %v3255_v45, %v3252_v47  ;;  %v1300_v37 = vpack.c.bf16 %v1266_v52, %v1265_v26  ;;  %v2440_v6 = vpack.i.bf16 %v727_v55, %v687_v27  ;;  %v1235_v46 = vsel %vm1228_vm7, %v2977_v14, %v2348_v3 }
 0x1db   : > { %2386 = vrot.lane.b32.xlu1 %v2370_v58, %s2667_s7  ;;  %2411 = vrot.lane.b32.xlu0 %v2410_v24, %s2666_s10  ;;  %v681_v51 = vsel %vm651_vm3, %v679_v57, %v680_v48  ;;  %v725_v40 = vsel %vm651_vm3, %v680_v48, 0.0  ;;  %v1236_v33 = vsel %vm1228_vm7, %v2980_v15, %v2349_v63  ;;  %v726_v49 = vsel %vm651_vm3, %v683_v1, 0.0 }
 0x1dc   : > { %1555 = vmatmul.bf16.gmra.mxu1 %v1299_v29  ;;  %2391 = vrot.lane.b32.xlu2 %v2390_v41, %s2666_s10  ;;  %v2400_v58 = vpack.i.bf16 %v725_v40, %v681_v51  ;;  %v2415_v13 = vpack.i.bf16 %v3163_v28, %v3160_v34  ;;  %v1302_v16 = vpack.c.bf16 %v1236_v33, %v1235_v46  ;;  %v643_v27 = vsel %vm554_vm4, 0.0, %v579_v50 }
 0x1dd   : > { %v2420_v20 = vpack.i.bf16 %v726_v49, %v684_v4  ;;  %v3291_v36 = vadd.f32 %v2825_v17, %v502_v22  ;;  %v2435_v38 = vpack.i.bf16 %v3191_v44, %v3188_v10  ;;  %v2377_v26 = vpop.permute.xlu2 %2376 }
 0x1de   : > { %v2379_v1 = vunpack.i.h.bf16 %v2377_v26 }
 0x1df   : > { %v688_v28 = vrot.slane %v3291_v36, 1  ;;  %v591_v52 = vrot.slane %v3291_v36, 7 }
 0x1e1   : > { %v504_v5 = vpop.f32.mrf.mxu0 }
 0x1e2   : > { %2134 = vmatmul.msk.bf16.gmra.mxu3 %vm940_vm5, %v1301_v18  ;;  %v505_v14 = vadd.f32 %v2825_v17, %v504_v5 }
 0x1e3   : > { %2401 = vrot.lane.b32.xlu1 %v2400_v58, %s2666_s10  ;;  %2426 = vrot.lane.b32.xlu0 %v2410_v24, %s2667_s7 }
 0x1e4   : > { %1644 = vmatmul.bf16.gmra.mxu2 %v1300_v37  ;;  %2406 = vrot.lane.b32.xlu2 %v2390_v41, %s2667_s7  ;;  %v2455_v15 = vpack.i.bf16 %v505_v14, %v3291_v36  ;;  %v689_v60 = vrot.slane %v505_v14, 1  ;;  %v592_v18 = vrot.slane %v505_v14, 7  ;;  %v2378_v37 = vunpack.i.l.bf16 %v2377_v26 }
 0x1e6   : > { %v690_v39 = vsel %vm651_vm3, %v688_v28, %v689_v60  ;;  %v728_v44 = vsel %vm651_vm3, %v689_v60, 0.0  ;;  %v957_v4 = vsel %vm940_vm5, %v643_v27, %v2378_v37 }
 0x1e7   : > { %v2460_v42 = vpack.i.bf16 %v728_v44, %v690_v39 }
 0x1e9   : > { %v507_v32 = vpop.f32.mrf.mxu0 }
 0x1ea   : > { %v3334_v50 = vadd.f32 %v2825_v17, %v507_v32 }
 0x1eb   : > { %2416 = vrot.lane.b32.xlu1 %v2415_v13, %s2665_s9  ;;  %2441 = vrot.lane.b32.xlu0 %v2440_v6, %s2666_s10 }
 0x1ec   : > { %1560 = vmatmul.bf16.gmra.mxu1 %v1302_v16  ;;  %2421 = vrot.lane.b32.xlu2 %v2420_v20, %s2666_s10 }
 0x1f1   : > { %v509_v23 = vpop.f32.mrf.mxu0 }
 0x1f2   : > { %v3337_v49 = vadd.f32 %v2825_v17, %v509_v23 }
 0x1f3   : > { %2456 = vrot.lane.b32.xlu0 %v2455_v15, %s2665_s9 }
 0x1f4   : > { %2436 = vrot.lane.b32.xlu2 %v2435_v38, %s2665_s9  ;;  %v595_v5 = vrot.slane %v3337_v49, 7  ;;  %v2475_v28 = vpack.i.bf16 %v3337_v49, %v3334_v50 }
 0x1f9   : > { %v512_v16 = vpop.f32.mrf.mxu0 }
 0x1fa   : > { %v3351_v15 = vadd.f32 %v2825_v17, %v512_v16 }
 0x201   : > { %v514_v38 = vpop.f32.mrf.mxu0 }
 0x202   : > { %v3356_v60 = vadd.f32 %v2825_v17, %v514_v38 }
 0x215   : > { %v2352_v0 = vpop.permute.xlu0 %2351 }
 0x216   : > { %v2354_v53 = vunpack.i.h.bf16 %v2352_v0  ;;  %v2353_v24 = vunpack.i.l.bf16 %v2352_v0  ;;  %v3361_v0 = vld [vmem:[%s3758_s4] ss:$0 sm:$0xff] }
 0x217   : > { %v1546_v20 = vpop.f32.mrf.mxu1 }
 0x218   : > { %v1304_v57 = vpack.c.bf16 %v2354_v53, %v2353_v24  ;;  %v1267_v48 = vsel %vm973_vm6, %v2348_v3, %v2353_v24  ;;  %v1268_v29 = vsel %vm973_vm6, %v2349_v63, %v2354_v53  ;;  %v3316_v63 = vsel %vm554_vm4, %v591_v52, %v592_v18 }
 0x219   : > { %v1303_v41 = vpack.c.bf16 %v1268_v29, %v1267_v48  ;;  %v597_v53 = vrot.slane %v3351_v15, 7  ;;  %v598_v24 = vrot.slane %v3356_v60, 7  ;;  %v1547_v29 = vadd.f32 %v3361_v0, %v1546_v20 }
 0x21a   : > { %2135 = vmatmul.msk.bf16.gmra.mxu3 %vm940_vm5, %v1304_v57 }
 0x21b   : > { %1649 = vmatmul.bf16.gmra.mxu2 %v1303_v41  ;;  %v3372_v17 = vsel %vm554_vm4, %v597_v53, %v598_v24 }
 0x21d   : > { %v2367_v51 = vpop.permute.xlu0 %2366 }
 0x21e   : > { %v2369_v40 = vunpack.i.h.bf16 %v2367_v51  ;;  %v2368_v22 = vunpack.i.l.bf16 %v2367_v51 }
 0x21f   : > { %v1548_v57 = vpop.f32.mrf.mxu1 }
 0x220   : > { %v1237_v62 = vsel %vm1228_vm7, %v3045_v7, %v2368_v22  ;;  %v1238_v2 = vsel %vm1228_vm7, %v3048_v9, %v2369_v40  ;;  %v958_v9 = vsel %vm940_vm5, %v3118_v21, %v2379_v1  ;;  %v594_v21 = vrot.slane %v3334_v50, 7 }
 0x221   : > { %v1305_v58 = vpack.c.bf16 %v1238_v2, %v1237_v62  ;;  %v517_v62 = vpop.f32.mrf.mxu0 }
 0x222   : > { %v3345_v13 = vsel %vm554_vm4, %v594_v21, %v595_v5 }
 0x223   : > { %1565 = vmatmul.bf16.gmra.mxu1 %v1305_v58 }
 0x225   : > { %v2382_v3 = vpop.permute.xlu0 %2381 }
 0x226   : > { %v2384_v55 = vunpack.i.h.bf16 %v2382_v3  ;;  %v2383_v7 = vunpack.i.l.bf16 %v2382_v3 }
 0x228   : > { %v3325_v6 = vsel %vm973_vm6, %v957_v4, %v2383_v7  ;;  %v3328_v46 = vsel %vm973_vm6, %v958_v9, %v2384_v55 }
 0x229   : > { %v2430_v33 = vpack.i.bf16 %v3328_v46, %v3325_v6  ;;  %v519_v38 = vpop.f32.mrf.mxu0 }
 0x22b   : > { %2431 = vrot.lane.b32.xlu1 %v2430_v33, %s2666_s10 }
 0x22d   : > { %v2397_v44 = vpop.permute.xlu0 %2396 }
 0x233   : > { %2446 = vrot.lane.b32.xlu1 %v2430_v33, %s2667_s7 }
 0x236   : > { %v3347_v14 = vpop.permute.xlu2 %2391 }
 0x23b   : > { %2461 = vrot.lane.b32.xlu1 %v2460_v42, %s2666_s10 }
 0x23e   : > { %v3366_v48 = vpop.permute.xlu2 %2406 }
 0x243   : > { %2476 = vrot.lane.b32.xlu1 %v2475_v28, %s2665_s9  ;;  %v2562_v28 = vld [vmem:[%s3756_s2] ss:$0 sm:$0xff] }
 0x244   : > { %v3395_v24 = vadd.f32 %v2562_v28, %v517_v62  ;;  %v2408_v62 = vunpack.i.l.bf16 %v3366_v48 }
 0x245   : > { %v1724_v41 = vpop.f32.mrf.mxu3  ;;  %v2372_v39 = vpop.permute.xlu1 %2371 }
 0x246   : > { %v2374_v42 = vunpack.i.h.bf16 %v2372_v39  ;;  %v2373_v51 = vunpack.i.l.bf16 %v2372_v39  ;;  %v1635_v26 = vpop.f32.mrf.mxu2  ;;  %v3384_v9 = vpop.permute.xlu2 %2421  ;;  %v2398_v39 = vunpack.i.l.bf16 %v2397_v44 }
 0x247   : > { %v1636_v18 = vadd.f32 %v1635_v26, %v1547_v29  ;;  %v2409_v26 = vunpack.i.h.bf16 %v3366_v48 }
 0x248   : > { %v1307_v2 = vpack.c.bf16 %v2374_v42, %v2373_v51  ;;  %v1269_v58 = vsel %vm973_vm6, %v2368_v22, %v2373_v51  ;;  %v1270_v32 = vsel %vm973_vm6, %v2369_v40, %v2374_v42  ;;  %v1551_v27 = vpop.f32.mrf.mxu1  ;;  %v1549_v22 = vadd.f32 %v3361_v0, %v1548_v57 }
 0x249   : > { %v1725_v1 = vadd.f32 %v1724_v41, %v1636_v18  ;;  %v1306_v37 = vpack.c.bf16 %v1270_v32, %v1269_v58  ;;  %v2399_v41 = vunpack.i.h.bf16 %v2397_v44  ;;  %v2393_v42 = vunpack.i.l.bf16 %v3347_v14 }
 0x24a   : > { %2136 = vmatmul.msk.bf16.gmra.mxu3 %vm940_vm5, %v1307_v2  ;;  %v3398_v51 = vadd.f32 %v2562_v28, %v519_v38  ;;  %v1552_v2 = vadd.f32 %v3361_v0, %v1551_v27 }
 0x24b   : > { %v1804_v3 = vpack.c.bf16 %v1725_v1, %v1725_v1  ;;  %1654 = vmatmul.bf16.gmra.mxu2 %v1306_v37  ;;  %v600_v1 = vrot.slane %v3395_v24, 7 }
 0x24d   : > { %1837 = vst.msk [vmem:[%s3379_s26] sm:$0xf] %vm1836_vm10, %v1804_v3  ;;  %v1726_v55 = vpop.f32.mrf.mxu3  ;;  %v2387_v7 = vpop.permute.xlu1 %2386  ;;  %v601_v3 = vrot.slane %v3398_v51, 7 }
 0x24e   : > { %v2389_v40 = vunpack.i.h.bf16 %v2387_v7  ;;  %v2388_v4 = vunpack.i.l.bf16 %v2387_v7  ;;  %v3386_v33 = vpop.permute.xlu0 %2411  ;;  %v1637_v23 = vpop.f32.mrf.mxu2 }
 0x24f   : > { %v1638_v5 = vadd.f32 %v1637_v23, %v1549_v22  ;;  %v2437_v23 = vpop.permute.xlu2 %2436  ;;  %v2414_v34 = vunpack.i.h.bf16 %v3386_v33 }
 0x250   : > { %v1239_v16 = vsel %vm1228_vm7, %v3133_v59, %v2388_v4  ;;  %v1240_v20 = vsel %vm1228_vm7, %v3136_v8, %v2389_v40  ;;  %v644_v59 = vsel %vm554_vm4, 0.0, %v582_v11  ;;  %v2394_v8 = vunpack.i.h.bf16 %v3347_v14  ;;  %v1553_v7 = vpop.f32.mrf.mxu1 }
 0x251   : > { %v1727_v57 = vadd.f32 %v1726_v55, %v1638_v5  ;;  %v1308_v29 = vpack.c.bf16 %v1240_v20, %v1239_v16  ;;  %v1271_v32 = vsel %vm973_vm6, %v2388_v4, %v2393_v42  ;;  %v960_v55 = vsel %vm940_vm5, %v3154_v19, %v2399_v41 }
 0x252   : > { %v1272_v14 = vsel %vm973_vm6, %v2389_v40, %v2394_v8  ;;  %v959_v27 = vsel %vm940_vm5, %v644_v59, %v2398_v39  ;;  %v1310_v4 = vpack.c.bf16 %v2394_v8, %v2393_v42  ;;  %v1241_v19 = vsel %vm1228_vm7, %v3216_v54, %v2408_v62 }
 0x253   : > { %v1805_v18 = vpack.c.bf16 %v1727_v57, %v1727_v57  ;;  %1570 = vmatmul.bf16.gmra.mxu1 %v1308_v29  ;;  %v1309_v38 = vpack.c.bf16 %v1272_v14, %v1271_v32  ;;  %v1242_v57 = vsel %vm1228_vm7, %v3219_v25, %v2409_v26  ;;  %v3438_v29 = vsel %vm554_vm4, %v600_v1, %v601_v3 }
 0x254   : > { %v2439_v41 = vunpack.i.h.bf16 %v2437_v23  ;;  %v2438_v39 = vunpack.i.l.bf16 %v2437_v23  ;;  %v645_v54 = vsel %vm554_vm4, 0.0, %v585_v35  ;;  %v646_v42 = vsel %vm554_vm4, 0.0, %v588_v12 }
 0x255   : > { %v1729_v58 = vpop.f32.mrf.mxu3  ;;  %v2402_v44 = vpop.permute.xlu1 %2401  ;;  %1838 = vst.msk [vmem:[%s3379_s26 + $0x4] sm:$0xf] %vm1836_vm10, %v1805_v18  ;;  %v691_v25 = vrot.slane %v3334_v50, 1  ;;  %v692_v8 = vrot.slane %v3337_v49, 1  ;;  %v2424_v18 = vunpack.i.h.bf16 %v3384_v9  ;;  %v1311_v32 = vpack.c.bf16 %v1242_v57, %v1241_v19 }
 0x256   : > { %v2404_v61 = vunpack.i.h.bf16 %v2402_v44  ;;  %v2403_v11 = vunpack.i.l.bf16 %v2402_v44  ;;  %v3411_v37 = vpop.permute.xlu0 %2426  ;;  %v1640_v22 = vpop.f32.mrf.mxu2  ;;  %v1554_v35 = vadd.f32 %v3361_v0, %v1553_v7  ;;  %v963_v49 = vsel %vm940_vm5, %v646_v42, %v2438_v39 }
 0x257   : > { %v1641_v5 = vadd.f32 %v1640_v22, %v1552_v2  ;;  %v2423_v2 = vunpack.i.l.bf16 %v3384_v9  ;;  %v2428_v48 = vunpack.i.l.bf16 %v3411_v37 }
 0x258   : > { %v3419_v16 = vsel %vm973_vm6, %v959_v27, %v2403_v11  ;;  %v3422_v20 = vsel %vm973_vm6, %v960_v55, %v2404_v61  ;;  %v964_v11 = vsel %vm940_vm5, %v3203_v56, %v2439_v41  ;;  %v693_v41 = vsel %vm651_vm3, %v691_v25, %v692_v8 }
 0x259   : > { %v2450_v40 = vpack.i.bf16 %v3422_v20, %v3419_v16  ;;  %v1730_v28 = vadd.f32 %v1729_v58, %v1641_v5  ;;  %v1556_v7 = vpop.f32.mrf.mxu1  ;;  %v697_v25 = vrot.slane %v3395_v24, 1 }
 0x25a   : > { %2137 = vmatmul.msk.bf16.gmra.mxu3 %vm940_vm5, %v1310_v4  ;;  %v1557_v39 = vadd.f32 %v3361_v0, %v1556_v7  ;;  %v2495_v7 = vpack.i.bf16 %v3356_v60, %v3351_v15 }
 0x25b   : > { %2451 = vrot.lane.b32.xlu2 %v2450_v40, %s2666_s10  ;;  %1659 = vmatmul.bf16.gmra.mxu2 %v1309_v38  ;;  %v1806_v59 = vpack.c.bf16 %v1730_v28, %v1730_v28  ;;  %v2413_v38 = vunpack.i.l.bf16 %v3386_v33  ;;  %v729_v33 = vsel %vm651_vm3, %v692_v8, 0.0 }
 0x25d   : > { %v1731_v58 = vpop.f32.mrf.mxu3  ;;  %v2417_v44 = vpop.permute.xlu1 %2416  ;;  %1839 = vst.msk [vmem:[%s3379_s26 + $0x8] sm:$0xf] %vm1836_vm10, %v1806_v59 }
 0x25e   : > { %v2419_v10 = vunpack.i.h.bf16 %v2417_v44  ;;  %v2418_v12 = vunpack.i.l.bf16 %v2417_v44  ;;  %v2442_v61 = vpop.permute.xlu0 %2441  ;;  %v1642_v9 = vpop.f32.mrf.mxu2 }
 0x25f   : > { %v2444_v14 = vunpack.i.h.bf16 %v2442_v61  ;;  %v2443_v3 = vunpack.i.l.bf16 %v2442_v61  ;;  %v1643_v22 = vadd.f32 %v1642_v9, %v1554_v35 }
 0x260   : > { %v962_v55 = vsel %vm940_vm5, %v3175_v43, %v2419_v10  ;;  %v961_v27 = vsel %vm940_vm5, %v645_v54, %v2418_v12  ;;  %v1273_v54 = vsel %vm973_vm6, %v2408_v62, %v2413_v38  ;;  %v2429_v62 = vunpack.i.h.bf16 %v3411_v37 }
 0x261   : > { %v3462_v4 = vsel %vm973_vm6, %v963_v49, %v2443_v3  ;;  %v3465_v23 = vsel %vm973_vm6, %v964_v11, %v2444_v14  ;;  %v3468_v56 = vsel %vm973_vm6, %v961_v27, %v2423_v2  ;;  %v3471_v5 = vsel %vm973_vm6, %v962_v55, %v2424_v18  ;;  %v1558_v35 = vpop.f32.mrf.mxu1 }
 0x262   : > { %v1732_v43 = vadd.f32 %v1731_v58, %v1643_v22  ;;  %v2490_v28 = vpack.i.bf16 %v3465_v23, %v3462_v4  ;;  %v2470_v19 = vpack.i.bf16 %v3471_v5, %v3468_v56  ;;  %v1313_v18 = vpack.c.bf16 %v2414_v34, %v2413_v38 }
 0x263   : > { %2466 = vrot.lane.b32.xlu2 %v2450_v40, %s2667_s7  ;;  %1575 = vmatmul.bf16.gmra.mxu1 %v1311_v32  ;;  %v1274_v40 = vsel %vm973_vm6, %v2409_v26, %v2414_v34  ;;  %v2480_v58 = vpack.i.bf16 %v729_v33, %v693_v41  ;;  %v698_v32 = vrot.slane %v3398_v51, 1  ;;  %v694_v26 = vrot.slane %v3351_v15, 1 }
 0x264   : > { %v1807_v57 = vpack.c.bf16 %v1732_v43, %v1732_v43  ;;  %2491 = vrot.lane.b32.xlu1 %v2490_v28, %s2666_s10  ;;  %2471 = vrot.lane.b32.xlu0 %v2470_v19, %s2666_s10  ;;  %v1312_v44 = vpack.c.bf16 %v1274_v40, %v1273_v54  ;;  %v695_v34 = vrot.slane %v3356_v60, 1  ;;  %v1559_v11 = vadd.f32 %v3361_v0, %v1558_v35 }
 0x265   : > { %v1734_v42 = vpop.f32.mrf.mxu3  ;;  %v699_v12 = vsel %vm651_vm3, %v697_v25, %v698_v32  ;;  %v731_v61 = vsel %vm651_vm3, %v698_v32, 0.0  ;;  %v1243_v49 = vsel %vm1228_vm7, %v3252_v47, %v2428_v48  ;;  %v1244_v14 = vsel %vm1228_vm7, %v3255_v45, %v2429_v62 }
 0x266   : > { %1840 = vst.msk [vmem:[%s3379_s26 + $0xc] sm:$0xf] %vm1836_vm10, %v1807_v57  ;;  %v696_v9 = vsel %vm651_vm3, %v694_v26, %v695_v34  ;;  %v730_v55 = vsel %vm651_vm3, %v695_v34, 0.0  ;;  %v2520_v27 = vpack.i.bf16 %v731_v61, %v699_v12  ;;  %v1314_v43 = vpack.c.bf16 %v1244_v14, %v1243_v49 }
 0x267   : > { %v1645_v59 = vpop.f32.mrf.mxu2  ;;  %v2515_v45 = vpack.i.bf16 %v3398_v51, %v3395_v24 }
 0x268   : > { %v1646_v2 = vadd.f32 %v1645_v59, %v1557_v39 }
 0x26a   : > { %v1735_v8 = vadd.f32 %v1734_v42, %v1646_v2  ;;  %2138 = vmatmul.msk.bf16.gmra.mxu3 %vm940_vm5, %v1313_v18 }
 0x26b   : > { %2481 = vrot.lane.b32.xlu2 %v2480_v58, %s2666_s10  ;;  %1664 = vmatmul.bf16.gmra.mxu2 %v1312_v44 }
 0x26c   : > { %v1808_v10 = vpack.c.bf16 %v1735_v8, %v1735_v8  ;;  %2506 = vrot.lane.b32.xlu1 %v2490_v28, %s2667_s7  ;;  %2486 = vrot.lane.b32.xlu0 %v2470_v19, %s2667_s7  ;;  %v2500_v28 = vpack.i.bf16 %v730_v55, %v696_v9  ;;  %v1561_v19 = vpop.f32.mrf.mxu1  ;;  %v647_v9 = vsel %vm554_vm4, 0.0, %v591_v52 }
 0x26d   : > { %v1736_v22 = vpop.f32.mrf.mxu3  ;;  %v1562_v60 = vadd.f32 %v3361_v0, %v1561_v19 }
 0x26e   : > { %1841 = vst.msk [vmem:[%s3379_s26 + $0x10] sm:$0xf] %vm1836_vm10, %v1808_v10 }
 0x26f   : > { %v1647_v37 = vpop.f32.mrf.mxu2 }
 0x270   : > { %v1648_v3 = vadd.f32 %v1647_v37, %v1559_v11 }
 0x272   : > { %v1737_v38 = vadd.f32 %v1736_v22, %v1648_v3 }
 0x273   : > { %2496 = vrot.lane.b32.xlu2 %v2495_v7, %s2665_s9  ;;  %1580 = vmatmul.bf16.gmra.mxu1 %v1314_v43 }
 0x274   : > { %v1809_v47 = vpack.c.bf16 %v1737_v38, %v1737_v38  ;;  %2521 = vrot.lane.b32.xlu1 %v2520_v27, %s2666_s10  ;;  %2501 = vrot.lane.b32.xlu0 %v2500_v28, %s2666_s10  ;;  %v1563_v51 = vpop.f32.mrf.mxu1 }
 0x275   : > { %v1564_v44 = vadd.f32 %v3361_v0, %v1563_v51 }
 0x276   : > { %1842 = vst.msk [vmem:[%s3379_s26 + $0x14] sm:$0xf] %vm1836_vm10, %v1809_v47 }
 0x27c   : > { %2516 = vrot.lane.b32.xlu0 %v2515_v45, %s2665_s9 }
 0x29d   : > { %v2432_v57 = vpop.permute.xlu1 %2431  ;;  %v1739_v33 = vpop.f32.mrf.mxu3 }
 0x29e   : > { %v2434_v41 = vunpack.i.h.bf16 %v2432_v57  ;;  %v2433_v39 = vunpack.i.l.bf16 %v2432_v57  ;;  %v1650_v54 = vpop.f32.mrf.mxu2 }
 0x29f   : > { %v1651_v40 = vadd.f32 %v1650_v54, %v1562_v60 }
 0x2a0   : > { %v1316_v42 = vpack.c.bf16 %v2434_v41, %v2433_v39  ;;  %v1275_v59 = vsel %vm973_vm6, %v2428_v48, %v2433_v39  ;;  %v1276_v18 = vsel %vm973_vm6, %v2429_v62, %v2434_v41  ;;  %v2457_v48 = vpop.permute.xlu0 %2456 }
 0x2a1   : > { %v1740_v2 = vadd.f32 %v1739_v33, %v1651_v40  ;;  %v1315_v25 = vpack.c.bf16 %v1276_v18, %v1275_v59  ;;  %v2459_v37 = vunpack.i.h.bf16 %v2457_v48  ;;  %v2458_v49 = vunpack.i.l.bf16 %v2457_v48  ;;  %v1566_v40 = vpop.f32.mrf.mxu1 }
 0x2a2   : > { %2139 = vmatmul.msk.bf16.gmra.mxu3 %vm940_vm5, %v1316_v42 }
 0x2a3   : > { %v1810_v58 = vpack.c.bf16 %v1740_v2, %v1740_v2  ;;  %1669 = vmatmul.bf16.gmra.mxu2 %v1315_v25  ;;  %v648_v2 = vsel %vm554_vm4, 0.0, %v594_v21  ;;  %v1567_v21 = vadd.f32 %v3361_v0, %v1566_v40 }
 0x2a5   : > { %1843 = vst.msk [vmem:[%s3379_s26 + $0x18] sm:$0xf] %vm1836_vm10, %v1810_v58  ;;  %v2447_v32 = vpop.permute.xlu1 %2446  ;;  %v1741_v10 = vpop.f32.mrf.mxu3 }
 0x2a6   : > { %v2449_v8 = vunpack.i.h.bf16 %v2447_v32  ;;  %v2448_v35 = vunpack.i.l.bf16 %v2447_v32  ;;  %v1652_v26 = vpop.f32.mrf.mxu2 }
 0x2a7   : > { %v1653_v34 = vadd.f32 %v1652_v26, %v1564_v44 }
 0x2a8   : > { %v1245_v62 = vsel %vm1228_vm7, %v3244_v30, %v2448_v35  ;;  %v1246_v12 = vsel %vm1228_vm7, %v3247_v31, %v2449_v8  ;;  %v966_v30 = vsel %vm940_vm5, %v3316_v63, %v2459_v37  ;;  %v965_v31 = vsel %vm940_vm5, %v647_v9, %v2458_v49 }
 0x2a9   : > { %v1742_v61 = vadd.f32 %v1741_v10, %v1653_v34  ;;  %v1317_v11 = vpack.c.bf16 %v1246_v12, %v1245_v62  ;;  %v1568_v50 = vpop.f32.mrf.mxu1 }
 0x2aa   : > { %v1569_v10 = vadd.f32 %v3361_v0, %v1568_v50 }
 0x2ab   : > { %v1811_v14 = vpack.c.bf16 %v1742_v61, %v1742_v61  ;;  %1585 = vmatmul.bf16.gmra.mxu1 %v1317_v11 }
 0x2ad   : > { %1844 = vst.msk [vmem:[%s3379_s26 + $0x1c] sm:$0xf] %vm1836_vm10, %v1811_v14  ;;  %v2462_v3 = vpop.permute.xlu1 %2461 }
 0x2ae   : > { %v2464_v55 = vunpack.i.h.bf16 %v2462_v3  ;;  %v2463_v27 = vunpack.i.l.bf16 %v2462_v3 }
 0x2b0   : > { %v3543_v22 = vsel %vm973_vm6, %v965_v31, %v2463_v27  ;;  %v3546_v7 = vsel %vm973_vm6, %v966_v30, %v2464_v55 }
 0x2b1   : > { %v2510_v38 = vpack.i.bf16 %v3546_v7, %v3543_v22 }
 0x2b3   : > { %2511 = vrot.lane.b32.xlu2 %v2510_v38, %s2666_s10 }
 0x2b5   : > { %v2452_v36 = vpop.permute.xlu2 %2451  ;;  %v2477_v41 = vpop.permute.xlu1 %2476 }
 0x2b6   : > { %v2454_v52 = vunpack.i.h.bf16 %v2452_v36  ;;  %v2453_v43 = vunpack.i.l.bf16 %v2452_v36  ;;  %v2479_v42 = vunpack.i.h.bf16 %v2477_v41  ;;  %v2478_v59 = vunpack.i.l.bf16 %v2477_v41 }
 0x2b8   : > { %v1319_v28 = vpack.c.bf16 %v2454_v52, %v2453_v43  ;;  %v1277_v47 = vsel %vm973_vm6, %v2448_v35, %v2453_v43  ;;  %v1278_v63 = vsel %vm973_vm6, %v2449_v8, %v2454_v52  ;;  %v968_v58 = vsel %vm940_vm5, %v3345_v13, %v2479_v42 }
 0x2b9   : > { %v1318_v45 = vpack.c.bf16 %v1278_v63, %v1277_v47 }
 0x2ba   : > { %2140 = vmatmul.msk.bf16.gmra.mxu3 %vm940_vm5, %v1319_v28 }
 0x2bb   : > { %2526 = vrot.lane.b32.xlu2 %v2510_v38, %s2667_s7  ;;  %1674 = vmatmul.bf16.gmra.mxu2 %v1318_v45 }
 0x2bd   : > { %v2467_v19 = vpop.permute.xlu2 %2466 }
 0x2be   : > { %v2469_v60 = vunpack.i.h.bf16 %v2467_v19  ;;  %v2468_v57 = vunpack.i.l.bf16 %v2467_v19 }
 0x2c0   : > { %v1247_v39 = vsel %vm1228_vm7, %v3325_v6, %v2468_v57  ;;  %v1248_v33 = vsel %vm1228_vm7, %v3328_v46, %v2469_v60  ;;  %v967_v6 = vsel %vm940_vm5, %v648_v2, %v2478_v59 }
 0x2c1   : > { %v1320_v54 = vpack.c.bf16 %v1248_v33, %v1247_v39 }
 0x2c3   : > { %1590 = vmatmul.bf16.gmra.mxu1 %v1320_v54 }
 0x2c5   : > { %v2482_v18 = vpop.permute.xlu2 %2481 }
 0x2c6   : > { %v2484_v25 = vunpack.i.h.bf16 %v2482_v18  ;;  %v2483_v51 = vunpack.i.l.bf16 %v2482_v18 }
 0x2c8   : > { %v3566_v46 = vsel %vm973_vm6, %v967_v6, %v2483_v51  ;;  %v3569_v44 = vsel %vm973_vm6, %v968_v58, %v2484_v25 }
 0x2c9   : > { %v2535_v32 = vpack.i.bf16 %v3569_v44, %v3566_v46 }
 0x2cb   : > { %2536 = vrot.lane.b32.xlu1 %v2535_v32, %s2667_s7  ;;  %2531 = vrot.lane.b32.xlu0 %v2535_v32, %s2666_s10 }
 0x2cd   : > { %v1744_v13 = vpop.f32.mrf.mxu3  ;;  %v2497_v19 = vpop.permute.xlu2 %2496 }
 0x2ce   : > { %v1655_v8 = vpop.f32.mrf.mxu2  ;;  %v2499_v54 = vunpack.i.h.bf16 %v2497_v19  ;;  %v2498_v40 = vunpack.i.l.bf16 %v2497_v19 }
 0x2cf   : > { %v1656_v35 = vadd.f32 %v1655_v8, %v1567_v21 }
 0x2d0   : > { %v1571_v48 = vpop.f32.mrf.mxu1  ;;  %v970_v6 = vsel %vm940_vm5, %v3372_v17, %v2499_v54 }
 0x2d1   : > { %v1745_v26 = vadd.f32 %v1744_v13, %v1656_v35  ;;  %v1572_v38 = vadd.f32 %v3361_v0, %v1571_v48 }
 0x2d3   : > { %v1812_v34 = vpack.c.bf16 %v1745_v26, %v1745_v26 }
 0x2d5   : > { %1845 = vst.msk [vmem:[%s3379_s26 + $0x20] sm:$0xf] %vm1836_vm10, %v1812_v34  ;;  %v1746_v62 = vpop.f32.mrf.mxu3 }
 0x2d6   : > { %v1657_v12 = vpop.f32.mrf.mxu2  ;;  %v2472_v61 = vpop.permute.xlu0 %2471 }
 0x2d7   : > { %v1658_v11 = vadd.f32 %v1657_v12, %v1569_v10  ;;  %v2474_v37 = vunpack.i.h.bf16 %v2472_v61  ;;  %v2473_v49 = vunpack.i.l.bf16 %v2472_v61  ;;  %v2492_v27 = vpop.permute.xlu1 %2491 }
 0x2d8   : > { %v1573_v52 = vpop.f32.mrf.mxu1  ;;  %v2494_v2 = vunpack.i.h.bf16 %v2492_v27  ;;  %v2493_v25 = vunpack.i.l.bf16 %v2492_v27 }
 0x2d9   : > { %v1747_v14 = vadd.f32 %v1746_v62, %v1658_v11  ;;  %v1322_v3 = vpack.c.bf16 %v2474_v37, %v2473_v49  ;;  %v1279_v9 = vsel %vm973_vm6, %v2468_v57, %v2473_v49  ;;  %v1280_v55 = vsel %vm973_vm6, %v2469_v60, %v2474_v37 }
 0x2da   : > { %v1321_v31 = vpack.c.bf16 %v1280_v55, %v1279_v9  ;;  %v1574_v42 = vadd.f32 %v3361_v0, %v1573_v52  ;;  %v1325_v34 = vpack.c.bf16 %v2494_v2, %v2493_v25 }
 0x2db   : > { %v1813_v30 = vpack.c.bf16 %v1747_v14, %v1747_v14  ;;  %2141 = vmatmul.msk.bf16.gmra.mxu3 %vm940_vm5, %v1322_v3 }
 0x2dc   : > { %1679 = vmatmul.bf16.gmra.mxu2 %v1321_v31  ;;  %v650_v31 = vsel %vm554_vm4, 0.0, %v600_v1  ;;  %v2668_v1 = vmov 0.0  }
 0x2dd   : > { %1846 = vst.msk [vmem:[%s3379_s26 + $0x24] sm:$0xf] %vm1836_vm10, %v1813_v30  ;;  %v1749_v36 = vpop.f32.mrf.mxu3 }
 0x2de   : > { %v1660_v43 = vpop.f32.mrf.mxu2  ;;  %v2487_v28 = vpop.permute.xlu0 %2486 }
 0x2df   : > { %v1661_v47 = vadd.f32 %v1660_v43, %v1572_v38  ;;  %v2489_v63 = vunpack.i.h.bf16 %v2487_v28  ;;  %v2488_v45 = vunpack.i.l.bf16 %v2487_v28  ;;  %v3590_v59 = vpop.permute.xlu1 %2506 }
 0x2e0   : > { %v1576_v32 = vpop.f32.mrf.mxu1  ;;  %v2509_v10 = vunpack.i.h.bf16 %v3590_v59  ;;  %v2508_v62 = vunpack.i.l.bf16 %v3590_v59 }
 0x2e1   : > { %v1750_v60 = vadd.f32 %v1749_v36, %v1661_v47  ;;  %v1249_v57 = vsel %vm1228_vm7, %v3419_v16, %v2488_v45  ;;  %v1250_v41 = vsel %vm1228_vm7, %v3422_v20, %v2489_v63  ;;  %v649_v20 = vsel %vm554_vm4, 0.0, %v597_v53 }
 0x2e2   : > { %v1323_v33 = vpack.c.bf16 %v1250_v41, %v1249_v57  ;;  %v969_v13 = vsel %vm940_vm5, %v649_v20, %v2498_v40  ;;  %v1281_v35 = vsel %vm973_vm6, %v2488_v45, %v2493_v25  ;;  %v1282_v26 = vsel %vm973_vm6, %v2489_v63, %v2494_v2 }
 0x2e3   : > { %v1814_v39 = vpack.c.bf16 %v1750_v60, %v1750_v60  ;;  %v1324_v12 = vpack.c.bf16 %v1282_v26, %v1281_v35  ;;  %v1577_v61 = vadd.f32 %v3361_v0, %v1576_v32  ;;  %v1251_v27 = vsel %vm1228_vm7, %v3468_v56, %v2508_v62 }
 0x2e4   : > { %1595 = vmatmul.bf16.gmra.mxu1 %v1323_v33  ;;  %v1252_v30 = vsel %vm1228_vm7, %v3471_v5, %v2509_v10 }
 0x2e5   : > { %1847 = vst.msk [vmem:[%s3379_s26 + $0x28] sm:$0xf] %vm1836_vm10, %v1814_v39  ;;  %v1751_v18 = vpop.f32.mrf.mxu3  ;;  %v1326_v45 = vpack.c.bf16 %v1252_v30, %v1251_v27 }
 0x2e6   : > { %v1662_v51 = vpop.f32.mrf.mxu2  ;;  %v2502_v58 = vpop.permute.xlu0 %2501 }
 0x2e7   : > { %v1663_v16 = vadd.f32 %v1662_v51, %v1574_v42  ;;  %v2504_v50 = vunpack.i.h.bf16 %v2502_v58  ;;  %v2503_v21 = vunpack.i.l.bf16 %v2502_v58  ;;  %v2522_v11 = vpop.permute.xlu1 %2521 }
 0x2e8   : > { %v2524_v38 = vunpack.i.h.bf16 %v2522_v11  ;;  %v2523_v36 = vunpack.i.l.bf16 %v2522_v11  ;;  %v1578_v43 = vpop.f32.mrf.mxu1 }
 0x2e9   : > { %v1752_v8 = vadd.f32 %v1751_v18, %v1663_v16  ;;  %v3603_v48 = vsel %vm973_vm6, %v969_v13, %v2503_v21  ;;  %v3606_v15 = vsel %vm973_vm6, %v970_v6, %v2504_v50  ;;  %v1579_v24 = vadd.f32 %v3361_v0, %v1578_v43 }
 0x2ea   : > { %v2545_v17 = vpack.i.bf16 %v3606_v15, %v3603_v48 }
 0x2eb   : > { %v1815_v53 = vpack.c.bf16 %v1752_v8, %v1752_v8  ;;  %2142 = vmatmul.msk.bf16.gmra.mxu3 %vm940_vm5, %v1325_v34 }
 0x2ec   : > { %2546 = vrot.lane.b32.xlu0 %v2545_v17, %s2667_s7  ;;  %2541 = vrot.lane.b32.xlu2 %v2545_v17, %s2666_s10 }
 0x2ed   : > { %1848 = vst.msk [vmem:[%s3379_s26 + $0x2c] sm:$0xf] %vm1836_vm10, %v1815_v53  ;;  %1684 = vmatmul.bf16.gmra.mxu2 %v1324_v12  ;;  %v1754_v37 = vpop.f32.mrf.mxu3 }
 0x2ee   : > { %v1665_v49 = vpop.f32.mrf.mxu2  ;;  %v2517_v14 = vpop.permute.xlu0 %2516 }
 0x2ef   : > { %v1666_v3 = vadd.f32 %v1665_v49, %v1577_v61  ;;  %v2519_v9 = vunpack.i.h.bf16 %v2517_v14  ;;  %v2518_v55 = vunpack.i.l.bf16 %v2517_v14 }
 0x2f0   : > { %v1581_v32 = vpop.f32.mrf.mxu1 }
 0x2f1   : > { %v1755_v52 = vadd.f32 %v1754_v37, %v1666_v3  ;;  %v972_v28 = vsel %vm940_vm5, %v3438_v29, %v2519_v9  ;;  %v971_v47 = vsel %vm940_vm5, %v650_v31, %v2518_v55  ;;  %v1582_v50 = vadd.f32 %v3361_v0, %v1581_v32 }
 0x2f2   : > { %v1004_v56 = vsel %vm973_vm6, %v971_v47, %v2523_v36  ;;  %v1005_v5 = vsel %vm973_vm6, %v972_v28, %v2524_v38 }
 0x2f3   : > { %v1816_v63 = vpack.c.bf16 %v1755_v52, %v1755_v52  ;;  %v2550_v19 = vpack.i.bf16 %v1005_v5, %v1004_v56 }
 0x2f4   : > { %1195 = vrot.lane.b32.xlu0 %v2668_v1, %s2666_s10  ;;  %1600 = vmatmul.bf16.gmra.mxu1 %v1326_v45 }
 0x2f5   : > { %1849 = vst.msk [vmem:[%s3379_s26 + $0x30] sm:$0xf] %vm1836_vm10, %v1816_v63  ;;  %2551 = vrot.lane.b32.xlu1 %v2550_v19, %s2666_s10  ;;  %2556 = vrot.lane.b32.xlu2 %v2550_v19, %s2667_s7  ;;  %v1756_v57 = vpop.f32.mrf.mxu3 }
 0x2f6   : > { %v1667_v29 = vpop.f32.mrf.mxu2 }
 0x2f7   : > { %v1668_v60 = vadd.f32 %v1667_v29, %v1579_v24 }
 0x2f8   : > { %v1583_v26 = vpop.f32.mrf.mxu1 }
 0x2f9   : > { %v1757_v41 = vadd.f32 %v1756_v57, %v1668_v60  ;;  %v1584_v53 = vadd.f32 %v3361_v0, %v1583_v26 }
 0x2fb   : > { %v1817_v39 = vpack.c.bf16 %v1757_v41, %v1757_v41 }
 0x2fd   : > { %1850 = vst.msk [vmem:[%s3379_s26 + $0x34] sm:$0xf] %vm1836_vm10, %v1817_v39 }
 0x30d   : > { %v2512_v33 = vpop.permute.xlu2 %2511 }
 0x30e   : > { %v2514_v54 = vunpack.i.h.bf16 %v2512_v33  ;;  %v2513_v40 = vunpack.i.l.bf16 %v2512_v33 }
 0x310   : > { %v1328_v42 = vpack.c.bf16 %v2514_v54, %v2513_v40  ;;  %v1283_v59 = vsel %vm973_vm6, %v2508_v62, %v2513_v40  ;;  %v1284_v18 = vsel %vm973_vm6, %v2509_v10, %v2514_v54 }
 0x311   : > { %v1327_v2 = vpack.c.bf16 %v1284_v18, %v1283_v59 }
 0x312   : > { %2143 = vmatmul.msk.bf16.gmra.mxu3 %vm940_vm5, %v1328_v42 }
 0x313   : > { %1689 = vmatmul.bf16.gmra.mxu2 %v1327_v2 }
 0x315   : > { %v2527_v25 = vpop.permute.xlu2 %2526 }
 0x316   : > { %v2529_v51 = vunpack.i.h.bf16 %v2527_v25  ;;  %v2528_v58 = vunpack.i.l.bf16 %v2527_v25 }
 0x318   : > { %v1253_v16 = vsel %vm1228_vm7, %v3462_v4, %v2528_v58  ;;  %v1254_v20 = vsel %vm1228_vm7, %v3465_v23, %v2529_v51 }
 0x319   : > { %v1329_v6 = vpack.c.bf16 %v1254_v20, %v1253_v16 }
 0x31b   : > { %1605 = vmatmul.bf16.gmra.mxu1 %v1329_v6 }
 0x325   : > { %v1759_v21 = vpop.f32.mrf.mxu3 }
 0x326   : > { %v1670_v13 = vpop.f32.mrf.mxu2 }
 0x327   : > { %v1671_v8 = vadd.f32 %v1670_v13, %v1582_v50 }
 0x328   : > { %v1586_v12 = vpop.f32.mrf.mxu1 }
 0x329   : > { %v1760_v35 = vadd.f32 %v1759_v21, %v1671_v8  ;;  %v1587_v61 = vadd.f32 %v3361_v0, %v1586_v12 }
 0x32b   : > { %v1818_v34 = vpack.c.bf16 %v1760_v35, %v1760_v35 }
 0x32d   : > { %1851 = vst.msk [vmem:[%s3379_s26 + $0x38] sm:$0xf] %vm1836_vm10, %v1818_v34  ;;  %v1761_v10 = vpop.f32.mrf.mxu3 }
 0x32e   : > { %v1672_v4 = vpop.f32.mrf.mxu2 }
 0x32f   : > { %v1673_v17 = vadd.f32 %v1672_v4, %v1584_v53 }
 0x330   : > { %v1588_v45 = vpop.f32.mrf.mxu1 }
 0x331   : > { %v1762_v23 = vadd.f32 %v1761_v10, %v1673_v17  ;;  %v1589_v5 = vadd.f32 %v3361_v0, %v1588_v45 }
 0x333   : > { %v1819_v62 = vpack.c.bf16 %v1762_v23, %v1762_v23 }
 0x335   : > { %1852 = vst.msk [vmem:[%s3379_s26 + $0x3c] sm:$0xf] %vm1836_vm10, %v1819_v62 }
 0x33d   : > { %v2537_v11 = vpop.permute.xlu1 %2536  ;;  %v2532_v37 = vpop.permute.xlu0 %2531 }
 0x33e   : > { %v2539_v49 = vunpack.i.h.bf16 %v2537_v11  ;;  %v2538_v14 = vunpack.i.l.bf16 %v2537_v11  ;;  %v2534_v3 = vunpack.i.h.bf16 %v2532_v37  ;;  %v2533_v9 = vunpack.i.l.bf16 %v2532_v37  ;;  %v1764_v55 = vpop.f32.mrf.mxu3  ;;  %v1675_v27 = vpop.f32.mrf.mxu2 }
 0x33f   : > { %v1676_v31 = vadd.f32 %v1675_v27, %v1587_v61 }
 0x340   : > { %v1331_v30 = vpack.c.bf16 %v2534_v3, %v2533_v9  ;;  %v1255_v38 = vsel %vm1228_vm7, %v3543_v22, %v2538_v14  ;;  %v1256_v36 = vsel %vm1228_vm7, %v3546_v7, %v2539_v49  ;;  %v1285_v43 = vsel %vm973_vm6, %v2528_v58, %v2533_v9  ;;  %v1591_v40 = vpop.f32.mrf.mxu1 }
 0x341   : > { %v1332_v52 = vpack.c.bf16 %v1256_v36, %v1255_v38  ;;  %v1286_v28 = vsel %vm973_vm6, %v2529_v51, %v2534_v3  ;;  %v1765_v47 = vadd.f32 %v1764_v55, %v1676_v31  ;;  %v1592_v42 = vadd.f32 %v3361_v0, %v1591_v40 }
 0x342   : > { %2144 = vmatmul.msk.bf16.gmra.mxu3 %vm940_vm5, %v1331_v30  ;;  %v1330_v63 = vpack.c.bf16 %v1286_v28, %v1285_v43 }
 0x343   : > { %1610 = vmatmul.bf16.gmra.mxu1 %v1332_v52  ;;  %v1820_v56 = vpack.c.bf16 %v1765_v47, %v1765_v47 }
 0x344   : > { %1694 = vmatmul.bf16.gmra.mxu2 %v1330_v63 }
 0x345   : > { %1853 = vst.msk [vmem:[%s3379_s26 + $0x40] sm:$0xf] %vm1836_vm10, %v1820_v56 }
 0x346   : > { %v1677_v22 = vpop.f32.mrf.mxu2  ;;  %v2542_v7 = vpop.permute.xlu2 %2541 }
 0x347   : > { %v1678_v19 = vadd.f32 %v1677_v22, %v1589_v5  ;;  %v1766_v24 = vpop.f32.mrf.mxu3  ;;  %v2544_v29 = vunpack.i.h.bf16 %v2542_v7  ;;  %v2543_v60 = vunpack.i.l.bf16 %v2542_v7 }
 0x348   : > { %v1593_v6 = vpop.f32.mrf.mxu1 }
 0x349   : > { %v1767_v1 = vadd.f32 %v1766_v24, %v1678_v19  ;;  %v1287_v41 = vsel %vm973_vm6, %v2538_v14, %v2543_v60  ;;  %v1288_v39 = vsel %vm973_vm6, %v2539_v49, %v2544_v29  ;;  %v1334_v33 = vpack.c.bf16 %v2544_v29, %v2543_v60 }
 0x34a   : > { %v1333_v54 = vpack.c.bf16 %v1288_v39, %v1287_v41  ;;  %v1594_v13 = vadd.f32 %v3361_v0, %v1593_v6 }
 0x34b   : > { %v1821_v57 = vpack.c.bf16 %v1767_v1, %v1767_v1 }
 0x34d   : > { %1854 = vst.msk [vmem:[%s3379_s26 + $0x44] sm:$0xf] %vm1836_vm10, %v1821_v57 }
 0x34f   : > { %v2557_v34 = vpop.permute.xlu2 %2556 }
 0x350   : > { %v2559_v62 = vunpack.i.h.bf16 %v2557_v34  ;;  %v2558_v12 = vunpack.i.l.bf16 %v2557_v34 }
 0x352   : > { %2145 = vmatmul.msk.bf16.gmra.mxu3 %vm940_vm5, %v1334_v33  ;;  %v1259_v14 = vsel %vm1228_vm7, %v3603_v48, %v2558_v12  ;;  %v1260_v3 = vsel %vm1228_vm7, %v3606_v15, %v2559_v62 }
 0x353   : > { %v1338_v30 = vpack.c.bf16 %v1260_v3, %v1259_v14 }
 0x354   : > { %1699 = vmatmul.bf16.gmra.mxu2 %v1333_v54 }
 0x35e   : > { %v2547_v59 = vpop.permute.xlu0 %2546  ;;  %v1769_v18 = vpop.f32.mrf.mxu3 }
 0x35f   : > { %v2549_v2 = vunpack.i.h.bf16 %v2547_v59  ;;  %v2548_v25 = vunpack.i.l.bf16 %v2547_v59  ;;  %v1680_v51 = vpop.f32.mrf.mxu2 }
 0x360   : > { %v1681_v58 = vadd.f32 %v1680_v51, %v1592_v42 }
 0x361   : > { %v1257_v16 = vsel %vm1228_vm7, %v3566_v46, %v2548_v25  ;;  %v1258_v20 = vsel %vm1228_vm7, %v3569_v44, %v2549_v2  ;;  %v1596_v17 = vpop.f32.mrf.mxu1 }
 0x362   : > { %v1770_v32 = vadd.f32 %v1769_v18, %v1681_v58  ;;  %v1335_v50 = vpack.c.bf16 %v1258_v20, %v1257_v16  ;;  %v1597_v49 = vadd.f32 %v3361_v0, %v1596_v17 }
 0x364   : > { %v1822_v21 = vpack.c.bf16 %v1770_v32, %v1770_v32  ;;  %1615 = vmatmul.bf16.gmra.mxu1 %v1335_v50 }
 0x366   : > { %1855 = vst.msk [vmem:[%s3379_s26 + $0x48] sm:$0xf] %vm1836_vm10, %v1822_v21  ;;  %v1771_v8 = vpop.f32.mrf.mxu3  ;;  %v1196_v52 = vpop.permute.xlu0 %1195 }
 0x367   : > { %v2552_v35 = vpop.permute.xlu1 %2551  ;;  %v1682_v26 = vpop.f32.mrf.mxu2  ;;  %v1340_v28 = vpack.c.bf16 %v1196_v52, %v1196_v52  ;;  %v1291_v48 = vsel %vm973_vm6, %v2558_v12, %v1196_v52  ;;  %v1292_v15 = vsel %vm973_vm6, %v2559_v62, %v1196_v52 }
 0x368   : > { %v2554_v53 = vunpack.i.h.bf16 %v2552_v35  ;;  %v2553_v4 = vunpack.i.l.bf16 %v2552_v35  ;;  %v1683_v46 = vadd.f32 %v1682_v26, %v1594_v13  ;;  %v1339_v5 = vpack.c.bf16 %v1292_v15, %v1291_v48 }
 0x369   : > { %v1598_v38 = vpop.f32.mrf.mxu1 }
 0x36a   : > { %v1337_v10 = vpack.c.bf16 %v2554_v53, %v2553_v4  ;;  %v1772_v44 = vadd.f32 %v1771_v8, %v1683_v46  ;;  %v1289_v23 = vsel %vm973_vm6, %v2548_v25, %v2553_v4  ;;  %v1290_v61 = vsel %vm973_vm6, %v2549_v2, %v2554_v53  ;;  %v2563_v25 = vld [vmem:[%s3758_s4] ss:$0 sm:$0xff] }
 0x36b   : > { %v1336_v37 = vpack.c.bf16 %v1290_v61, %v1289_v23  ;;  %v1599_v43 = vadd.f32 %v3361_v0, %v1598_v38 }
 0x36c   : > { %v1823_v11 = vpack.c.bf16 %v1772_v44, %v1772_v44  ;;  %2146 = vmatmul.msk.bf16.gmra.mxu3 %vm940_vm5, %v1337_v10 }
 0x36d   : > { %1704 = vmatmul.bf16.gmra.mxu2 %v1336_v37 }
 0x36e   : > { %1856 = vst.msk [vmem:[%s3379_s26 + $0x4c] sm:$0xf] %vm1836_vm10, %v1823_v11  ;;  %v1774_v9 = vpop.f32.mrf.mxu3 }
 0x370   : > { %v1685_v55 = vpop.f32.mrf.mxu2 }
 0x371   : > { %v1686_v27 = vadd.f32 %v1685_v55, %v1597_v49  ;;  %v1601_v7 = vpop.f32.mrf.mxu1 }
 0x372   : > { %v1602_v19 = vadd.f32 %v3361_v0, %v1601_v7 }
 0x373   : > { %v1775_v31 = vadd.f32 %v1774_v9, %v1686_v27 }
 0x374   : > { %1620 = vmatmul.bf16.gmra.mxu1 %v1338_v30 }
 0x375   : > { %v1824_v36 = vpack.c.bf16 %v1775_v31, %v1775_v31 }
 0x376   : > { %v1776_v45 = vpop.f32.mrf.mxu3 }
 0x377   : > { %1857 = vst.msk [vmem:[%s3379_s26 + $0x50] sm:$0xf] %vm1836_vm10, %v1824_v36 }
 0x378   : > { %v1687_v47 = vpop.f32.mrf.mxu2 }
 0x379   : > { %v1688_v63 = vadd.f32 %v1687_v47, %v1599_v43  ;;  %v1603_v57 = vpop.f32.mrf.mxu1 }
 0x37a   : > { %v1604_v39 = vadd.f32 %v3361_v0, %v1603_v57 }
 0x37b   : > { %v1777_v56 = vadd.f32 %v1776_v45, %v1688_v63 }
 0x37c   : > { %2147 = vmatmul.msk.bf16.gmra.mxu3 %vm940_vm5, %v1340_v28 }
 0x37d   : > { %v1825_v22 = vpack.c.bf16 %v1777_v56, %v1777_v56  ;;  %1709 = vmatmul.bf16.gmra.mxu2 %v1339_v5 }
 0x37f   : > { %1858 = vst.msk [vmem:[%s3379_s26 + $0x54] sm:$0xf] %vm1836_vm10, %v1825_v22 }
 0x395   : > { %v1779_v24 = vpop.f32.mrf.mxu3 }
 0x396   : > { %v1690_v1 = vpop.f32.mrf.mxu2 }
 0x397   : > { %v1691_v29 = vadd.f32 %v1690_v1, %v1602_v19 }
 0x398   : > { %v1606_v18 = vpop.f32.mrf.mxu1 }
 0x399   : > { %v1780_v60 = vadd.f32 %v1779_v24, %v1691_v29  ;;  %v1607_v51 = vadd.f32 %v2563_v25, %v1606_v18 }
 0x39b   : > { %v1826_v41 = vpack.c.bf16 %v1780_v60, %v1780_v60 }
 0x39d   : > { %1859 = vst.msk [vmem:[%s3379_s26 + $0x58] sm:$0xf] %vm1836_vm10, %v1826_v41  ;;  %v1781_v40 = vpop.f32.mrf.mxu3 }
 0x39e   : > { %v1692_v33 = vpop.f32.mrf.mxu2 }
 0x39f   : > { %v1693_v54 = vadd.f32 %v1692_v33, %v1604_v39 }
 0x3a0   : > { %v1608_v16 = vpop.f32.mrf.mxu1 }
 0x3a1   : > { %v1782_v42 = vadd.f32 %v1781_v40, %v1693_v54  ;;  %v1609_v50 = vadd.f32 %v2563_v25, %v1608_v16 }
 0x3a3   : > { %v1827_v59 = vpack.c.bf16 %v1782_v42, %v1782_v42 }
 0x3a5   : > { %1860 = vst.msk [vmem:[%s3379_s26 + $0x5c] sm:$0xf] %vm1836_vm10, %v1827_v59 }
 0x3c0   : > { %v1611_v8 = vpop.f32.mrf.mxu1 }
 0x3c1   : > { %v1612_v34 = vadd.f32 %v2563_v25, %v1611_v8 }
 0x3c5   : > { %v1784_v2 = vpop.f32.mrf.mxu3 }
 0x3c7   : > { %v1695_v58 = vpop.f32.mrf.mxu2 }
 0x3c8   : > { %v1696_v0 = vadd.f32 %v1695_v58, %v1607_v51  ;;  %v1613_v10 = vpop.f32.mrf.mxu1 }
 0x3c9   : > { %v1614_v23 = vadd.f32 %v2563_v25, %v1613_v10 }
 0x3ca   : > { %v1785_v20 = vadd.f32 %v1784_v2, %v1696_v0 }
 0x3cc   : > { %v1828_v6 = vpack.c.bf16 %v1785_v20, %v1785_v20 }
 0x3cd   : > { %v1786_v32 = vpop.f32.mrf.mxu3 }
 0x3ce   : > { %1861 = vst.msk [vmem:[%s3379_s26 + $0x60] sm:$0xf] %vm1836_vm10, %v1828_v6 }
 0x3cf   : > { %v1697_v21 = vpop.f32.mrf.mxu2 }
 0x3d0   : > { %v1698_v13 = vadd.f32 %v1697_v21, %v1609_v50 }
 0x3d2   : > { %v1787_v35 = vadd.f32 %v1786_v32, %v1698_v13 }
 0x3d4   : > { %v1829_v26 = vpack.c.bf16 %v1787_v35, %v1787_v35 }
 0x3d5   : > { %v1789_v53 = vpop.f32.mrf.mxu3 }
 0x3d6   : > { %1862 = vst.msk [vmem:[%s3379_s26 + $0x64] sm:$0xf] %vm1836_vm10, %v1829_v26 }
 0x3d7   : > { %v1700_v4 = vpop.f32.mrf.mxu2 }
 0x3d8   : > { %v1701_v46 = vadd.f32 %v1700_v4, %v1612_v34 }
 0x3da   : > { %v1790_v17 = vadd.f32 %v1789_v53, %v1701_v46 }
 0x3dc   : > { %v1830_v44 = vpack.c.bf16 %v1790_v17, %v1790_v17 }
 0x3dd   : > { %v1791_v61 = vpop.f32.mrf.mxu3 }
 0x3de   : > { %1863 = vst.msk [vmem:[%s3379_s26 + $0x68] sm:$0xf] %vm1836_vm10, %v1830_v44 }
 0x3df   : > { %v1702_v62 = vpop.f32.mrf.mxu2 }
 0x3e0   : > { %v1703_v12 = vadd.f32 %v1702_v62, %v1614_v23 }
 0x3e1   : > { %v1616_v49 = vpop.f32.mrf.mxu1 }
 0x3e2   : > { %v1792_v11 = vadd.f32 %v1791_v61, %v1703_v12  ;;  %v1617_v3 = vadd.f32 %v2563_v25, %v1616_v49 }
 0x3e4   : > { %v1831_v37 = vpack.c.bf16 %v1792_v11, %v1792_v11 }
 0x3e6   : > { %1864 = vst.msk [vmem:[%s3379_s26 + $0x6c] sm:$0xf] %vm1836_vm10, %v1831_v37 }
 0x3e9   : > { %v1618_v9 = vpop.f32.mrf.mxu1 }
 0x3ea   : > { %v1619_v36 = vadd.f32 %v2563_v25, %v1618_v9 }
 0x3ef   : > { %v1794_v14 = vpop.f32.mrf.mxu3 }
 0x3f0   : > { %v1705_v55 = vpop.f32.mrf.mxu2 }
 0x3f1   : > { %v1706_v27 = vadd.f32 %v1705_v55, %v1617_v3  ;;  %v1621_v28 = vpop.f32.mrf.mxu1 }
 0x3f2   : > { %v1622_v15 = vadd.f32 %v2563_v25, %v1621_v28 }
 0x3f3   : > { %v1795_v30 = vadd.f32 %v1794_v14, %v1706_v27 }
 0x3f5   : > { %v1832_v31 = vpack.c.bf16 %v1795_v30, %v1795_v30 }
 0x3f7   : > { %v1796_v38 = vpop.f32.mrf.mxu3  ;;  %1865 = vst.msk [vmem:[%s3379_s26 + $0x70] sm:$0xf] %vm1836_vm10, %v1832_v31 }
 0x3f8   : > { %v1707_v52 = vpop.f32.mrf.mxu2 }
 0x3f9   : > { %v1708_v43 = vadd.f32 %v1707_v52, %v1619_v36  ;;  %v1623_v22 = vpop.f32.mrf.mxu1 }
 0x3fa   : > { %v1624_v19 = vadd.f32 %v2563_v25, %v1623_v22 }
 0x3fb   : > { %v1797_v47 = vadd.f32 %v1796_v38, %v1708_v43 }
 0x3fd   : > { %v1833_v48 = vpack.c.bf16 %v1797_v47, %v1797_v47 }
 0x3ff   : > { %1866 = vst.msk [vmem:[%s3379_s26 + $0x74] sm:$0xf] %vm1836_vm10, %v1833_v48  ;;  %v1799_v63 = vpop.f32.mrf.mxu3 }
 0x400   : > { %v1710_v45 = vpop.f32.mrf.mxu2 }
 0x401   : > { %v1711_v56 = vadd.f32 %v1710_v45, %v1622_v15 }
 0x403   : > { %v1800_v5 = vadd.f32 %v1799_v63, %v1711_v56 }
 0x405   : > { %v1834_v7 = vpack.c.bf16 %v1800_v5, %v1800_v5 }
 0x407   : > { %1867 = vst.msk [vmem:[%s3379_s26 + $0x78] sm:$0xf] %vm1836_vm10, %v1834_v7  ;;  %v1801_v29 = vpop.f32.mrf.mxu3 }
 0x408   : > { %v1712_v24 = vpop.f32.mrf.mxu2 }
 0x409   : > { %v1713_v1 = vadd.f32 %v1712_v24, %v1624_v19 }
 0x40b   : > { %v1802_v60 = vadd.f32 %v1801_v29, %v1713_v1 }
 0x40d   : > { %v1835_v57 = vpack.c.bf16 %v1802_v60, %v1802_v60 }
 0x40f   : > { %1868 = vst.msk [vmem:[%s3379_s26 + $0x7c] sm:$0xf] %vm1836_vm10, %v1835_v57 }
 0x410   : > { %2621 = shalt.err (!%p2618_p4)
}
 0x411   : > { %s2669_s12 = smov 4  }
 0x412   : > { %2193 = dma.vmem_to_hbm [thread:$0]  (%p2750_p11), %s1883_s15, 2048, %s1885_s16, %s1870_s22, %s2666_s10, %s2666_s10, %s2669_s12  }
 0x413 PF: > { %s1899_s26 = sand.u32 1, %s2648_s18   ;;  %p3767_p7 = scmp.ge.s32.totalorder %s2660_s21, 2 }
 0x414   : > { %s1900_s28 = scalar_lea.sflag [#allocation4], %s1899_s26 }
 0x415   : > { %p2200_p5 = pnand %p3767_p7, %p2754_p12 }
 0x417   : > { %p2201_p8 = pneg %p2200_p5 }
 0x419   : > { %2643 = dma.done.wait (%p2201_p8), %s1900_s28, 2048  }
 0x41a   : > { %2645 = vsyncadd (%p2201_p8), %s1900_s28, 4294965248  ;;  %p18_p10 = scmp.ge.s32.totalorder %s2725_s24, 4   ;;  %s3768_s18 = smov %s2652_s19 }
 0x41b   : > { %s3769_s19 = smov %s2656_s20  ;;  %s3770_s20 = smov %s2737_s27 }
 0x41c   : > { %s3771_s21 = smov %s2725_s24  ;;  %20 = sbr.rel (!%p18_p10) target bundleno = 5 (0x5), region = 85 }
 0x421   :  { %1906 = vsyncpa [#allocation3], 1 }
 0x422   :  { %1908 = vsyncpa [#allocation3 + $0x1], 1 }
 0x423   :  { %1909 = vsyncpa [#allocation4], 1 }
 0x424   :  { %1911 = vsyncpa [#allocation4 + $0x1], 1 }

</bundles_post_ra>
